<compile_context>
chip_gen: v7x
topology: tpu7x:2x2x1
jax: 0.10.0
libtpu: 0.0.40
codegen_flags: <defaults>
</compile_context>

<pallas_src>
import functools

import jax
import jax.numpy as jnp
from jax import lax
from jax.experimental import pallas as pl
from jax.experimental.pallas import tpu as pltpu

LN_EPS = 1e-12
MASK_FILL = -10000.0
VMEM_LIMIT = 48 * 1024 * 1024   # conservative (fits v7x's 64 MiB VMEM)


# ---------------------------------------------------------------------------
# tiling helpers
# ---------------------------------------------------------------------------
def _ceil_to(x, m):
    return ((x + m - 1) // m) * m


def _pick_tile(dim, pref, base):
    """Pick a block size for `dim`.

    Returns (tile, padded_dim): either tile == padded_dim (single full-extent
    block, always legal) or tile is a multiple of `base` dividing padded_dim.
    """
    if dim <= base:
        return dim, dim
    dim_p = _ceil_to(dim, base)
    if dim_p <= pref:
        return dim_p, dim_p
    t = pref
    while t > base:
        if dim_p % t == 0:
            return t, dim_p
        t //= 2
    return base, dim_p


# ---------------------------------------------------------------------------
# generic tiled linear:  x @ w + b   (bf16 operands, f32 accumulation)
# ---------------------------------------------------------------------------
def _linear_kernel(x_ref, w_ref, b_ref, o_ref, acc_ref):
    @pl.when(pl.program_id(2) == 0)
    def _():
        acc_ref[...] = jnp.zeros_like(acc_ref)

    acc_ref[...] += jnp.dot(x_ref[...].astype(jnp.bfloat16), w_ref[...],
                            preferred_element_type=jnp.float32)

    @pl.when(pl.program_id(2) == pl.num_programs(2) - 1)
    def _():
        o_ref[...] = (acc_ref[...] + b_ref[...]).astype(o_ref.dtype)


def linear_pallas(x, w, b, *, out_dtype=jnp.float32,
                  tm_pref=256, tn_pref=256, tk_pref=512):
    """Tiled (x @ w + b). N padded to a multiple of 128 for lane-dense stores."""
    M, K = x.shape
    N = w.shape[1]
    tm, Mp = _pick_tile(M, tm_pref, 8)
    tk, Kp = _pick_tile(K, tk_pref, 128)
    tn, Np = _pick_tile(_ceil_to(N, 128), tn_pref, 128)

    w = w.astype(jnp.bfloat16)
    if Mp != M or Kp != K:
        x = jnp.pad(x, ((0, Mp - M), (0, Kp - K)))
    if Kp != K or Np != N:
        w = jnp.pad(w, ((0, Kp - K), (0, Np - N)))
    if Np != N:
        b = jnp.pad(b, (0, Np - N))

    out = pl.pallas_call(
        _linear_kernel,
        out_shape=jax.ShapeDtypeStruct((Mp, Np), out_dtype),
        grid=(Mp // tm, Np // tn, Kp // tk),
        in_specs=[pl.BlockSpec((tm, tk), lambda i, j, k: (i, k)),
                  pl.BlockSpec((tk, tn), lambda i, j, k: (k, j)),
                  pl.BlockSpec((1, tn), lambda i, j, k: (0, j))],
        out_specs=pl.BlockSpec((tm, tn), lambda i, j, k: (i, j)),
        scratch_shapes=[pltpu.VMEM((tm, tn), jnp.float32)],
        compiler_params=pltpu.CompilerParams(
            dimension_semantics=("parallel", "parallel", "arbitrary"),
            vmem_limit_bytes=VMEM_LIMIT),
        cost_estimate=pl.CostEstimate(
            flops=2 * Mp * Kp * Np, transcendentals=0,
            bytes_accessed=4 * Mp * Kp + 2 * Kp * Np + 4 * Mp * Np),
    )(x, w, b.reshape(1, Np))
    return out[:M, :N]


# ---------------------------------------------------------------------------
# fused  (x @ w + b) + residual -> LayerNorm      (attention out-projection)
# ---------------------------------------------------------------------------
def _linear_add_ln_kernel(x_ref, w_ref, b_ref, r_ref, g_ref, bb_ref, o_ref):
    y = jnp.dot(x_ref[...].astype(jnp.bfloat16), w_ref[...],
                preferred_element_type=jnp.float32)
    y = y + b_ref[...] + r_ref[...]
    mean = jnp.mean(y, axis=-1, keepdims=True)
    var = jnp.mean(jnp.square(y - mean), axis=-1, keepdims=True)
    o_ref[...] = (y - mean) * lax.rsqrt(var + LN_EPS) * g_ref[...] + bb_ref[...]


def linear_add_ln_pallas(x, w, b, res, gamma, beta, *, tm_pref=256):
    M, K = x.shape
    D = w.shape[1]
    tm, Mp = _pick_tile(M, tm_pref, 8)
    if Mp != M:
        x = jnp.pad(x, ((0, Mp - M), (0, 0)))
        res = jnp.pad(res, ((0, Mp - M), (0, 0)))
    out = pl.pallas_call(
        _linear_add_ln_kernel,
        out_shape=jax.ShapeDtypeStruct((Mp, D), jnp.float32),
        grid=(Mp // tm,),
        in_specs=[pl.BlockSpec((tm, K), lambda i: (i, 0)),
                  pl.BlockSpec((K, D), lambda i: (0, 0)),
                  pl.BlockSpec((1, D), lambda i: (0, 0)),
                  pl.BlockSpec((tm, D), lambda i: (i, 0)),
                  pl.BlockSpec((1, D), lambda i: (0, 0)),
                  pl.BlockSpec((1, D), lambda i: (0, 0))],
        out_specs=pl.BlockSpec((tm, D), lambda i: (i, 0)),
        compiler_params=pltpu.CompilerParams(
            dimension_semantics=("parallel",), vmem_limit_bytes=VMEM_LIMIT),
    )(x, w.astype(jnp.bfloat16), b.reshape(1, D), res,
      gamma.reshape(1, D), beta.reshape(1, D))
    return out[:M]


# ---------------------------------------------------------------------------
# fully fused position-wise FFN:  LN(relu(x@w1+b1)@w2 + b2 + x)
# ---------------------------------------------------------------------------
def _ffn_add_ln_kernel(x_ref, w1_ref, b1_ref, w2_ref, b2_ref,
                       g_ref, bb_ref, o_ref):
    x = x_ref[...]                                    # f32; also the residual
    h = jnp.dot(x.astype(jnp.bfloat16), w1_ref[...],
                preferred_element_type=jnp.float32) + b1_ref[...]
    h = jnp.maximum(h, 0.0)                           # ReLU
    y = jnp.dot(h.astype(jnp.bfloat16), w2_ref[...],
                preferred_element_type=jnp.float32) + b2_ref[...]
    y = y + x
    mean = jnp.mean(y, axis=-1, keepdims=True)
    var = jnp.mean(jnp.square(y - mean), axis=-1, keepdims=True)
    o_ref[...] = (y - mean) * lax.rsqrt(var + LN_EPS) * g_ref[...] + bb_ref[...]


def ffn_add_ln_pallas(x, w1, b1, w2, b2, gamma, beta, *, tm_pref=256):
    M, D = x.shape
    Hf = w1.shape[1]
    tm, Mp = _pick_tile(M, tm_pref, 8)
    if Mp != M:
        x = jnp.pad(x, ((0, Mp - M), (0, 0)))
    out = pl.pallas_call(
        _ffn_add_ln_kernel,
        out_shape=jax.ShapeDtypeStruct((Mp, D), jnp.float32),
        grid=(Mp // tm,),
        in_specs=[pl.BlockSpec((tm, D), lambda i: (i, 0)),
                  pl.BlockSpec((D, Hf), lambda i: (0, 0)),
                  pl.BlockSpec((1, Hf), lambda i: (0, 0)),
                  pl.BlockSpec((Hf, D), lambda i: (0, 0)),
                  pl.BlockSpec((1, D), lambda i: (0, 0)),
                  pl.BlockSpec((1, D), lambda i: (0, 0)),
                  pl.BlockSpec((1, D), lambda i: (0, 0))],
        out_specs=pl.BlockSpec((tm, D), lambda i: (i, 0)),
        compiler_params=pltpu.CompilerParams(
            dimension_semantics=("parallel",), vmem_limit_bytes=VMEM_LIMIT),
    )(x, w1.astype(jnp.bfloat16), b1.reshape(1, Hf),
      w2.astype(jnp.bfloat16), b2.reshape(1, D),
      gamma.reshape(1, D), beta.reshape(1, D))
    return out[:M]


# ---------------------------------------------------------------------------
# LayerNorm-only kernel (embedding LN; no residual / no zeros array)
# ---------------------------------------------------------------------------
def _ln_kernel(x_ref, g_ref, b_ref, o_ref):
    y = x_ref[...]
    mean = jnp.mean(y, axis=-1, keepdims=True)
    var = jnp.mean(jnp.square(y - mean), axis=-1, keepdims=True)
    o_ref[...] = (y - mean) * lax.rsqrt(var + LN_EPS) * g_ref[...] + b_ref[...]


def layernorm_pallas(x, gamma, beta, *, tm_pref=512):
    M, D = x.shape
    tm, Mp = _pick_tile(M, tm_pref, 8)
    if Mp != M:
        x = jnp.pad(x, ((0, Mp - M), (0, 0)))
    out = pl.pallas_call(
        _ln_kernel,
        out_shape=jax.ShapeDtypeStruct((Mp, D), jnp.float32),
        grid=(Mp // tm,),
        in_specs=[pl.BlockSpec((tm, D), lambda i: (i, 0)),
                  pl.BlockSpec((1, D), lambda i: (0, 0)),
                  pl.BlockSpec((1, D), lambda i: (0, 0))],
        out_specs=pl.BlockSpec((tm, D), lambda i: (i, 0)),
        compiler_params=pltpu.CompilerParams(dimension_semantics=("parallel",)),
    )(x, gamma.reshape(1, D), beta.reshape(1, D))
    return out[:M]


# ---------------------------------------------------------------------------
# attention: one grid step per batch, all heads, in-kernel mask
# ---------------------------------------------------------------------------
def _attention_kernel(q_ref, k_ref, v_ref, qp_ref, kp_ref, o_ref,
                      *, scale, causal):
    q = q_ref[...][0]                    # (H, Lq, dh) bf16
    k = k_ref[...][0]                    # (H, Lk, dh) bf16
    v = v_ref[...][0]                    # (H, Lk, dh) bf16
    _, Lq, _ = q.shape
    Lk = k.shape[1]

    s = jnp.einsum("hqd,hkd->hqk", q, k,
                   preferred_element_type=jnp.float32) * scale

    # mask = query-pad  x  key-pad  (x causal), built on the VPU — no dense
    # (L,L) mask DMA from HBM.
    mask = qp_ref[...][0] * kp_ref[...][0]            # (Lq,1)*(1,Lk) -> (Lq,Lk)
    if causal:
        row = lax.broadcasted_iota(jnp.int32, (Lq, Lk), 0)
        col = lax.broadcasted_iota(jnp.int32, (Lq, Lk), 1)
        mask = mask * (col <= row).astype(jnp.float32)
    s = jnp.where(mask[None, :, :] > 0.0, s, MASK_FILL)

    s = s - jnp.max(s, axis=-1, keepdims=True)
    e = jnp.exp(s)
    p = e * pl.reciprocal(jnp.sum(e, axis=-1, keepdims=True), approx=True)
    ctx = jnp.einsum("hqk,hkd->hqd", p.astype(jnp.bfloat16), v,
                     preferred_element_type=jnp.float32)
    o_ref[...] = ctx[None].astype(o_ref.dtype)


def attention_pallas(q, k, v, q_pad, k_pad, *, causal):
    """q: (B,H,Lq,dh) bf16; k,v: (B,H,Lk,dh) bf16; q_pad: (B,Lq,1); k_pad: (B,1,Lk)."""
    B, H, Lq, dh = q.shape
    Lk = k.shape[2]
    kernel = functools.partial(_attention_kernel,
                               scale=1.0 / float(dh) ** 0.5, causal=causal)
    return pl.pallas_call(
        kernel,
        out_shape=jax.ShapeDtypeStruct((B, H, Lq, dh), jnp.bfloat16),
        grid=(B,),
        in_specs=[pl.BlockSpec((1, H, Lq, dh), lambda b: (b, 0, 0, 0)),
                  pl.BlockSpec((1, H, Lk, dh), lambda b: (b, 0, 0, 0)),
                  pl.BlockSpec((1, H, Lk, dh), lambda b: (b, 0, 0, 0)),
                  pl.BlockSpec((1, Lq, 1), lambda b: (b, 0, 0)),
                  pl.BlockSpec((1, 1, Lk), lambda b: (b, 0, 0))],
        out_specs=pl.BlockSpec((1, H, Lq, dh), lambda b: (b, 0, 0, 0)),
        compiler_params=pltpu.CompilerParams(dimension_semantics=("parallel",)),
    )(q, k, v, q_pad, k_pad)


# ---------------------------------------------------------------------------
# model wiring (glue in JAX; hot paths are the Pallas kernels above)
# ---------------------------------------------------------------------------
def _split_heads(x, n_head):           # (B, L, D) -> (B, H, L, dh)
    B, L, D = x.shape
    return x.reshape(B, L, n_head, D // n_head).transpose(0, 2, 1, 3)


def _merge_heads(x):                   # (B, H, L, dh) -> (B*L, D)
    B, H, L, dh = x.shape
    return x.transpose(0, 2, 1, 3).reshape(B * L, H * dh)


def mha_self(x, q_pad, ones_k, p, n_head):
    B, L, D = x.shape
    # fused Q/K/V projection: one read of x, one matmul launch
    w_qkv = jnp.concatenate([p["wq"], p["wk"], p["wv"]], axis=1)
    b_qkv = jnp.concatenate([p["bq"], p["bk"], p["bv"]], axis=0)
    qkv = linear_pallas(x.reshape(B * L, D), w_qkv, b_qkv,
                        out_dtype=jnp.bfloat16)                  # (B*L, 3D)
    q = _split_heads(qkv[:, :D].reshape(B, L, D), n_head)
    k = _split_heads(qkv[:, D:2 * D].reshape(B, L, D), n_head)
    v = _split_heads(qkv[:, 2 * D:].reshape(B, L, D), n_head)
    ctx = attention_pallas(q, k, v, q_pad, ones_k, causal=True)
    return _merge_heads(ctx)                                     # (B*L, D) bf16


def mha_cross(x, enc, ones_q, k_pad, p, n_head):
    B, L, D = x.shape
    S = enc.shape[1]
    q = linear_pallas(x.reshape(B * L, D), p["wq"], p["bq"],
                      out_dtype=jnp.bfloat16)
    # fused K/V projection of the encoder output
    w_kv = jnp.concatenate([p["wk"], p["wv"]], axis=1)
    b_kv = jnp.concatenate([p["bk"], p["bv"]], axis=0)
    kv = linear_pallas(enc.reshape(B * S, D), w_kv, b_kv,
                       out_dtype=jnp.bfloat16)                   # (B*S, 2D)
    q = _split_heads(q.reshape(B, L, D), n_head)
    k = _split_heads(kv[:, :D].reshape(B, S, D), n_head)
    v = _split_heads(kv[:, D:].reshape(B, S, D), n_head)
    ctx = attention_pallas(q, k, v, ones_q, k_pad, causal=False)
    return _merge_heads(ctx)


def decoder_layer(x, enc, trg_q_pad, ones_k, ones_q, src_k_pad, p, n_head):
    B, L, D = x.shape
    x_flat = x.reshape(B * L, D)

    # masked self-attention -> out-projection + residual + LN (fused epilogue)
    ctx = mha_self(x, trg_q_pad, ones_k, p["self_attn"], n_head)
    x_flat = linear_add_ln_pallas(ctx, p["self_attn"]["wo"], p["self_attn"]["bo"],
                                  x_flat, p["ln1_g"], p["ln1_b"])

    # encoder-decoder attention -> out-projection + residual + LN (fused)
    ctx = mha_cross(x_flat.reshape(B, L, D), enc, ones_q, src_k_pad,
                    p["cross_attn"], n_head)
    x_flat = linear_add_ln_pallas(ctx, p["cross_attn"]["wo"], p["cross_attn"]["bo"],
                                  x_flat, p["ln2_g"], p["ln2_b"])

    # position-wise FFN (matmul+ReLU+matmul) + residual + LN, fully fused
    x_flat = ffn_add_ln_pallas(x_flat, p["ffn_w1"], p["ffn_b1"],
                               p["ffn_w2"], p["ffn_b2"],
                               p["ln3_g"], p["ln3_b"])
    return x_flat.reshape(B, L, D)


def decoder_forward(params, trg_ids, enc_src, src_mask, n_head):
    """trg_ids: (B,L) int32; enc_src: (B,S,D) f32; src_mask: (B,1,1,S) bool."""
    B, L = trg_ids.shape
    S = enc_src.shape[1]
    D = params["bert"]["word_emb"].shape[1]

    # only tiny pad vectors go to the attention kernel; the dense causal/pad
    # masks are recomputed in-kernel from iota (make_no_peak_mask semantics).
    trg_q_pad = (trg_ids != 0).astype(jnp.float32).reshape(B, L, 1)
    ones_k = jnp.ones((B, 1, L), jnp.float32)
    ones_q = jnp.ones((B, L, 1), jnp.float32)
    src_k_pad = src_mask.reshape(B, 1, S).astype(jnp.float32)

    # bert.embeddings: word + position + token_type(=0) embeddings, LayerNorm.
    # (gather/adds stay in XLA glue; LayerNorm runs in a Pallas kernel)
    be = params["bert"]
    emb = (be["word_emb"][trg_ids]
           + be["pos_emb"][:L][None, :, :]
           + be["tok_type_emb"][0][None, None, :])
    x = layernorm_pallas(emb.reshape(B * L, D), be["ln_g"], be["ln_b"])
    x = x.reshape(B, L, D)

    for lp in params["layers"]:
        x = decoder_layer(x, enc_src, trg_q_pad, ones_k, ones_q, src_k_pad,
                          lp, n_head)

    logits = linear_pallas(x.reshape(B * L, D), params["out_w"],
                           params["out_b"], out_dtype=jnp.float32)
    V = params["out_w"].shape[1]
    return logits.reshape(B, L, V)


# ---------------------------------------------------------------------------
# deterministic synthetic parameters (matmul weights stored in bf16)
# ---------------------------------------------------------------------------
def init_params(key, *, dec_voc_size, max_len, d_model, ffn_hidden, n_layers):
    keys = list(jax.random.split(key, 4 + n_layers * 12 + 2))
    it = iter(keys)

    def nrm(shape, scale=0.02, dtype=jnp.float32):
        return (scale * jax.random.normal(next(it), shape, jnp.float32)).astype(dtype)

    def zeros(n):
        return jnp.zeros((n,), jnp.float32)

    def ones(n):
        return jnp.ones((n,), jnp.float32)

    def attn_params():
        return {
            "wq": nrm((d_model, d_model), dtype=jnp.bfloat16), "bq": zeros(d_model),
            "wk": nrm((d_model, d_model), dtype=jnp.bfloat16), "bk": zeros(d_model),
            "wv": nrm((d_model, d_model), dtype=jnp.bfloat16), "bv": zeros(d_model),
            "wo": nrm((d_model, d_model), dtype=jnp.bfloat16), "bo": zeros(d_model),
        }

    params = {
        "bert": {
            "word_emb": nrm((dec_voc_size, d_model)),
            "pos_emb": nrm((max_len, d_model)),
            "tok_type_emb": nrm((2, d_model)),
            "ln_g": ones(d_model), "ln_b": zeros(d_model),
        },
        "layers": [],
    }
    for _ in range(n_layers):
        params["layers"].append({
            "self_attn": attn_params(),
            "cross_attn": attn_params(),
            "ln1_g": ones(d_model), "ln1_b": zeros(d_model),
            "ln2_g": ones(d_model), "ln2_b": zeros(d_model),
            "ln3_g": ones(d_model), "ln3_b": zeros(d_model),
            "ffn_w1": nrm((d_model, ffn_hidden), dtype=jnp.bfloat16),
            "ffn_b1": zeros(ffn_hidden),
            "ffn_w2": nrm((ffn_hidden, d_model), dtype=jnp.bfloat16),
            "ffn_b2": zeros(d_model),
        })
    params["out_w"] = nrm((d_model, dec_voc_size), dtype=jnp.bfloat16)
    params["out_b"] = zeros(dec_voc_size)
    return params


# ---------------------------------------------------------------------------
if __name__ == "__main__":
    B, L, S = 2, 8, 8
    d_model, n_head, ffn_hidden, n_layers = 32, 4, 64, 2
    dec_voc_size, max_len = 50, 16

    key = jax.random.PRNGKey(0)
    k_param, k_trg, k_enc, k_src = jax.random.split(key, 4)

    params = init_params(k_param, dec_voc_size=dec_voc_size, max_len=max_len,
                         d_model=d_model, ffn_hidden=ffn_hidden,
                         n_layers=n_layers)

    trg = jax.random.randint(k_trg, (B, L), 1, dec_voc_size).astype(jnp.int32)
    trg = trg.at[:, -2:].set(0)                       # some target padding
    enc_src = jax.random.normal(k_enc, (B, S, d_model), jnp.float32)
    src_ids = jax.random.randint(k_src, (B, S), 1, dec_voc_size)
    src_ids = src_ids.at[1, -3:].set(0)               # some source padding
    src_mask = (src_ids != 0).reshape(B, 1, 1, S)     # torch-style (B,1,1,S)

    # TODO(synk): dropout layers (embedding + per-sublayer) are identity (eval mode).
    fwd = jax.jit(functools.partial(decoder_forward, n_head=n_head))
    out = fwd(params, trg, enc_src, src_mask)
    jax.block_until_ready(out)
    assert out.shape == (B, L, dec_voc_size) and out.dtype == jnp.float32
    print("KERNEL_OK")
</pallas_src>

<mosaic_0001>
module attributes {stable_mosaic.version = 11 : i64} {
  func.func @_ln_kernel(%arg0: i32, %arg1: memref<16x32xf32, #tpu.memory_space<vmem>>, %arg2: memref<1x32xf32, #tpu.memory_space<vmem>>, %arg3: memref<1x32xf32, #tpu.memory_space<vmem>>, %arg4: memref<16x32xf32, #tpu.memory_space<vmem>>) attributes {dimension_semantics = [#tpu.dimension_semantics<parallel>], iteration_bounds = array<i64: 1>, scalar_prefetch = 0 : i64, scratch_operands = 0 : i64, tpu.core_type = #tpu.core_type<tc>, window_params = [{transform_indices = @transform_0, window_bounds = array<i64: 16, 32>}, {pipeline_mode = #tpu.pipeline_mode<synchronous>, transform_indices = @transform_1, window_bounds = array<i64: 1, 32>}, {pipeline_mode = #tpu.pipeline_mode<synchronous>, transform_indices = @transform_2, window_bounds = array<i64: 1, 32>}, {transform_indices = @transform_3, window_bounds = array<i64: 16, 32>}]} {
    %c0 = arith.constant 0 : index
    %c0_0 = arith.constant 0 : index
    %0 = vector.load %arg1[%c0, %c0_0] : memref<16x32xf32, #tpu.memory_space<vmem>>, vector<16x32xf32>
    %cst = arith.constant dense<0.000000e+00> : vector<16xf32>
    %1 = vector.multi_reduction <add>, %0, %cst [1] : vector<16x32xf32> to vector<16xf32>
    %2 = vector.shape_cast %1 : vector<16xf32> to vector<16x1xf32>
    %cst_1 = arith.constant 3.200000e+01 : f32
    %3 = vector.broadcast %cst_1 : f32 to vector<16x1xf32>
    %4 = arith.divf %2, %3 : vector<16x1xf32>
    %5 = vector.broadcast %4 : vector<16x1xf32> to vector<16x32xf32>
    %6 = arith.subf %0, %5 : vector<16x32xf32>
    %7 = arith.mulf %6, %6 : vector<16x32xf32>
    %cst_2 = arith.constant dense<0.000000e+00> : vector<16xf32>
    %8 = vector.multi_reduction <add>, %7, %cst_2 [1] : vector<16x32xf32> to vector<16xf32>
    %9 = vector.shape_cast %8 : vector<16xf32> to vector<16x1xf32>
    %cst_3 = arith.constant 3.200000e+01 : f32
    %10 = vector.broadcast %cst_3 : f32 to vector<16x1xf32>
    %11 = arith.divf %9, %10 : vector<16x1xf32>
    %12 = vector.broadcast %4 : vector<16x1xf32> to vector<16x32xf32>
    %13 = arith.subf %0, %12 : vector<16x32xf32>
    %cst_4 = arith.constant 9.99999996E-13 : f32
    %14 = vector.broadcast %cst_4 : f32 to vector<16x1xf32>
    %15 = arith.addf %11, %14 : vector<16x1xf32>
    %16 = math.rsqrt %15 : vector<16x1xf32>
    %17 = vector.broadcast %16 : vector<16x1xf32> to vector<16x32xf32>
    %18 = arith.mulf %13, %17 : vector<16x32xf32>
    %c0_5 = arith.constant 0 : index
    %c0_6 = arith.constant 0 : index
    %19 = vector.load %arg2[%c0_5, %c0_6] : memref<1x32xf32, #tpu.memory_space<vmem>>, vector<1x32xf32>
    %20 = vector.broadcast %19 : vector<1x32xf32> to vector<16x32xf32>
    %21 = arith.mulf %18, %20 : vector<16x32xf32>
    %c0_7 = arith.constant 0 : index
    %c0_8 = arith.constant 0 : index
    %22 = vector.load %arg3[%c0_7, %c0_8] : memref<1x32xf32, #tpu.memory_space<vmem>>, vector<1x32xf32>
    %23 = vector.broadcast %22 : vector<1x32xf32> to vector<16x32xf32>
    %24 = arith.addf %21, %23 : vector<16x32xf32>
    %c0_9 = arith.constant 0 : index
    %c0_10 = arith.constant 0 : index
    %25 = vector.load %arg4[%c0_9, %c0_10] : memref<16x32xf32, #tpu.memory_space<vmem>>, vector<16x32xf32>
    tpu.vector_store %arg4[%c0_9, %c0_10], %24 {strides = array<i32>} : memref<16x32xf32, #tpu.memory_space<vmem>>, vector<16x32xf32>,
    return
  }
  func.func @transform_0(%arg0: i32) -> (i32, i32) {
    %c0_i32 = arith.constant 0 : i32
    %c0_i32_0 = arith.constant 0 : i32
    return %arg0, %c0_i32 : i32, i32
  }
  func.func @transform_1(%arg0: i32) -> (i32, i32) {
    %c0_i32 = arith.constant 0 : i32
    %c0_i32_0 = arith.constant 0 : i32
    %c0_i32_1 = arith.constant 0 : i32
    return %c0_i32, %c0_i32_0 : i32, i32
  }
  func.func @transform_2(%arg0: i32) -> (i32, i32) {
    %c0_i32 = arith.constant 0 : i32
    %c0_i32_0 = arith.constant 0 : i32
    %c0_i32_1 = arith.constant 0 : i32
    return %c0_i32, %c0_i32_0 : i32, i32
  }
  func.func @transform_3(%arg0: i32) -> (i32, i32) {
    %c0_i32 = arith.constant 0 : i32
    %c0_i32_0 = arith.constant 0 : i32
    return %arg0, %c0_i32 : i32, i32
  }
}

module attributes {stable_mosaic.version = 11 : i64} {
  func.func @_linear_kernel(%arg0: i32, %arg1: i32, %arg2: i32, %arg3: memref<16x32xf32, #tpu.memory_space<vmem>>, %arg4: memref<32x128xbf16, #tpu.memory_space<vmem>>, %arg5: memref<1x128xf32, #tpu.memory_space<vmem>>, %arg6: memref<16x128xbf16, #tpu.memory_space<vmem>>, %arg7: memref<16x128xf32, #tpu.memory_space<vmem>>) attributes {dimension_semantics = [#tpu.dimension_semantics<parallel>, #tpu.dimension_semantics<parallel>, #tpu.dimension_semantics<arbitrary>], iteration_bounds = array<i64: 1, 1, 1>, scalar_prefetch = 0 : i64, scratch_operands = 1 : i64, tpu.core_type = #tpu.core_type<tc>, window_params = [{transform_indices = @transform_0, window_bounds = array<i64: 16, 32>}, {transform_indices = @transform_1, window_bounds = array<i64: 32, 128>}, {transform_indices = @transform_2, window_bounds = array<i64: 1, 128>}, {transform_indices = @transform_3, window_bounds = array<i64: 16, 128>}]} {
    %c0_i32 = arith.constant 0 : i32
    %0 = arith.cmpi eq, %arg2, %c0_i32 : i32
    %1 = arith.extui %0 : i1 to i32
    %c0_i32_0 = arith.constant 0 : i32
    %2 = arith.cmpi ne, %1, %c0_i32_0 : i32
    scf.if %2 {
      %cst_10 = arith.constant 0.000000e+00 : f32
      %13 = vector.broadcast %cst_10 : f32 to vector<16x128xf32>
      %c0_11 = arith.constant 0 : index
      %c0_12 = arith.constant 0 : index
      %14 = vector.load %arg7[%c0_11, %c0_12] : memref<16x128xf32, #tpu.memory_space<vmem>>, vector<16x128xf32>
      tpu.vector_store %arg7[%c0_11, %c0_12], %13 {strides = array<i32>} : memref<16x128xf32, #tpu.memory_space<vmem>>, vector<16x128xf32>,
    } else {
    }
    %c0 = arith.constant 0 : index
    %c0_1 = arith.constant 0 : index
    %3 = vector.load %arg7[%c0, %c0_1] : memref<16x128xf32, #tpu.memory_space<vmem>>, vector<16x128xf32>
    %c0_2 = arith.constant 0 : index
    %c0_3 = arith.constant 0 : index
    %4 = vector.load %arg3[%c0_2, %c0_3] : memref<16x32xf32, #tpu.memory_space<vmem>>, vector<16x32xf32>
    %5 = arith.truncf %4 : vector<16x32xf32> to vector<16x32xbf16>
    %c0_4 = arith.constant 0 : index
    %c0_5 = arith.constant 0 : index
    %6 = vector.load %arg4[%c0_4, %c0_5] : memref<32x128xbf16, #tpu.memory_space<vmem>>, vector<32x128xbf16>
    %cst = arith.constant dense<0.000000e+00> : vector<16x128xf32>
    %7 = tpu.matmul %5, %6, %cst {dimension_numbers = #tpu.dot_dimension_numbers<[1], [0], [0], [1], [0, 0, 1, 1], [], []>} : vector<16x32xbf16>, vector<32x128xbf16>, vector<16x128xf32> -> vector<16x128xf32>
    %8 = arith.addf %3, %7 : vector<16x128xf32>
    %c0_6 = arith.constant 0 : index
    %c0_7 = arith.constant 0 : index
    %9 = vector.load %arg7[%c0_6, %c0_7] : memref<16x128xf32, #tpu.memory_space<vmem>>, vector<16x128xf32>
    tpu.vector_store %arg7[%c0_6, %c0_7], %8 {strides = array<i32>} : memref<16x128xf32, #tpu.memory_space<vmem>>, vector<16x128xf32>,
    %c0_i32_8 = arith.constant 0 : i32
    %10 = arith.cmpi eq, %arg2, %c0_i32_8 : i32
    %11 = arith.extui %10 : i1 to i32
    %c0_i32_9 = arith.constant 0 : i32
    %12 = arith.cmpi ne, %11, %c0_i32_9 : i32
    scf.if %12 {
      %c0_10 = arith.constant 0 : index
      %c0_11 = arith.constant 0 : index
      %13 = vector.load %arg7[%c0_10, %c0_11] : memref<16x128xf32, #tpu.memory_space<vmem>>, vector<16x128xf32>
      %c0_12 = arith.constant 0 : index
      %c0_13 = arith.constant 0 : index
      %14 = vector.load %arg5[%c0_12, %c0_13] : memref<1x128xf32, #tpu.memory_space<vmem>>, vector<1x128xf32>
      %15 = vector.broadcast %14 : vector<1x128xf32> to vector<16x128xf32>
      %16 = arith.addf %13, %15 : vector<16x128xf32>
      %17 = arith.truncf %16 : vector<16x128xf32> to vector<16x128xbf16>
      %c0_14 = arith.constant 0 : index
      %c0_15 = arith.constant 0 : index
      %18 = vector.load %arg6[%c0_14, %c0_15] : memref<16x128xbf16, #tpu.memory_space<vmem>>, vector<16x128xbf16>
      tpu.vector_store %arg6[%c0_14, %c0_15], %17 {strides = array<i32>} : memref<16x128xbf16, #tpu.memory_space<vmem>>, vector<16x128xbf16>,
    } else {
    }
    return
  }
  func.func @transform_0(%arg0: i32, %arg1: i32, %arg2: i32) -> (i32, i32) {
    %c0_i32 = arith.constant 0 : i32
    return %arg0, %arg2 : i32, i32
  }
  func.func @transform_1(%arg0: i32, %arg1: i32, %arg2: i32) -> (i32, i32) {
    %c0_i32 = arith.constant 0 : i32
    return %arg2, %arg1 : i32, i32
  }
  func.func @transform_2(%arg0: i32, %arg1: i32, %arg2: i32) -> (i32, i32) {
    %c0_i32 = arith.constant 0 : i32
    %c0_i32_0 = arith.constant 0 : i32
    return %c0_i32, %arg1 : i32, i32
  }
  func.func @transform_3(%arg0: i32, %arg1: i32, %arg2: i32) -> (i32, i32) {
    %c0_i32 = arith.constant 0 : i32
    return %arg0, %arg1 : i32, i32
  }
}

module attributes {stable_mosaic.version = 11 : i64} {
  func.func @_attention_kernel(%arg0: i32, %arg1: memref<1x4x8x8xbf16, #tpu.memory_space<vmem>>, %arg2: memref<1x4x8x8xbf16, #tpu.memory_space<vmem>>, %arg3: memref<1x4x8x8xbf16, #tpu.memory_space<vmem>>, %arg4: memref<1x8x1xf32, #tpu.memory_space<vmem>>, %arg5: memref<1x1x8xf32, #tpu.memory_space<vmem>>, %arg6: memref<1x4x8x8xbf16, #tpu.memory_space<vmem>>) attributes {dimension_semantics = [#tpu.dimension_semantics<parallel>], iteration_bounds = array<i64: 2>, scalar_prefetch = 0 : i64, scratch_operands = 0 : i64, tpu.core_type = #tpu.core_type<tc>, window_params = [{transform_indices = @transform_0, window_bounds = array<i64: 1, 4, 8, 8>}, {transform_indices = @transform_1, window_bounds = array<i64: 1, 4, 8, 8>}, {transform_indices = @transform_2, window_bounds = array<i64: 1, 4, 8, 8>}, {transform_indices = @transform_3, window_bounds = array<i64: 1, 8, 1>}, {transform_indices = @transform_4, window_bounds = array<i64: 1, 1, 8>}, {transform_indices = @transform_5, window_bounds = array<i64: 1, 4, 8, 8>}]} {
    %c0 = arith.constant 0 : index
    %c0_0 = arith.constant 0 : index
    %c0_1 = arith.constant 0 : index
    %c0_2 = arith.constant 0 : index
    %0 = vector.load %arg1[%c0, %c0_0, %c0_1, %c0_2] : memref<1x4x8x8xbf16, #tpu.memory_space<vmem>>, vector<1x4x8x8xbf16>
    %1 = vector.shape_cast %0 : vector<1x4x8x8xbf16> to vector<4x8x8xbf16>
    %c0_3 = arith.constant 0 : index
    %c0_4 = arith.constant 0 : index
    %c0_5 = arith.constant 0 : index
    %c0_6 = arith.constant 0 : index
    %2 = vector.load %arg2[%c0_3, %c0_4, %c0_5, %c0_6] : memref<1x4x8x8xbf16, #tpu.memory_space<vmem>>, vector<1x4x8x8xbf16>
    %3 = vector.shape_cast %2 : vector<1x4x8x8xbf16> to vector<4x8x8xbf16>
    %c0_7 = arith.constant 0 : index
    %c0_8 = arith.constant 0 : index
    %c0_9 = arith.constant 0 : index
    %c0_10 = arith.constant 0 : index
    %4 = vector.load %arg3[%c0_7, %c0_8, %c0_9, %c0_10] : memref<1x4x8x8xbf16, #tpu.memory_space<vmem>>, vector<1x4x8x8xbf16>
    %5 = vector.shape_cast %4 : vector<1x4x8x8xbf16> to vector<4x8x8xbf16>
    "tpu.trace_start"() <{level = 10 : i32, message = "hqd,hkd->hqk"}> : () -> ()
    %cst = arith.constant dense<0.000000e+00> : vector<4x8x8xf32>
    %6 = tpu.matmul %1, %3, %cst {dimension_numbers = #tpu.dot_dimension_numbers<[2], [2], [1], [1], [0, 0, 0, 1, 1, 1], [0], [0]>} : vector<4x8x8xbf16>, vector<4x8x8xbf16>, vector<4x8x8xf32> -> vector<4x8x8xf32>
    "tpu.trace_stop"() : () -> ()
    %cst_11 = arith.constant 0.353553385 : f32
    %7 = vector.broadcast %cst_11 : f32 to vector<4x8x8xf32>
    %8 = arith.mulf %6, %7 : vector<4x8x8xf32>
    %c0_12 = arith.constant 0 : index
    %c0_13 = arith.constant 0 : index
    %c0_14 = arith.constant 0 : index
    %9 = vector.load %arg4[%c0_12, %c0_13, %c0_14] : memref<1x8x1xf32, #tpu.memory_space<vmem>>, vector<1x8x1xf32>
    %10 = vector.shape_cast %9 : vector<1x8x1xf32> to vector<8x1xf32>
    %c0_15 = arith.constant 0 : index
    %c0_16 = arith.constant 0 : index
    %c0_17 = arith.constant 0 : index
    %11 = vector.load %arg5[%c0_15, %c0_16, %c0_17] : memref<1x1x8xf32, #tpu.memory_space<vmem>>, vector<1x1x8xf32>
    %12 = vector.shape_cast %11 : vector<1x1x8xf32> to vector<1x8xf32>
    %13 = vector.broadcast %10 : vector<8x1xf32> to vector<8x8xf32>
    %14 = vector.broadcast %12 : vector<1x8xf32> to vector<8x8xf32>
    %15 = arith.mulf %13, %14 : vector<8x8xf32>
    %16 = tpu.iota {dimensions = array<i32: 0>} : vector<8x8xi32>
    %17 = tpu.iota {dimensions = array<i32: 1>} : vector<8x8xi32>
    %18 = arith.cmpi sle, %17, %16 : vector<8x8xi32>
    %19 = arith.extui %18 : vector<8x8xi1> to vector<8x8xi32>
    %20 = arith.sitofp %19 : vector<8x8xi32> to vector<8x8xf32>
    %21 = arith.mulf %15, %20 : vector<8x8xf32>
    %22 = vector.shape_cast %21 : vector<8x8xf32> to vector<1x8x8xf32>
    %cst_18 = arith.constant 0.000000e+00 : f32
    %23 = vector.broadcast %cst_18 : f32 to vector<1x8x8xf32>
    %24 = arith.cmpf ogt, %22, %23 : vector<1x8x8xf32>
    %cst_19 = arith.constant -1.000000e+04 : f32
    %25 = vector.shape_cast %24 : vector<1x8x8xi1> to vector<1x8x8xi1>
    %26 = vector.broadcast %25 : vector<1x8x8xi1> to vector<4x8x8xi1>
    %27 = vector.broadcast %cst_19 : f32 to vector<4x8x8xf32>
    %28 = arith.select %26, %8, %27 : vector<4x8x8xi1>, vector<4x8x8xf32>
    %cst_20 = arith.constant dense<0xFF800000> : vector<4x8xf32>
    %29 = vector.multi_reduction <maximumf>, %28, %cst_20 [2] : vector<4x8x8xf32> to vector<4x8xf32>
    %30 = vector.shape_cast %29 : vector<4x8xf32> to vector<4x8x1xf32>
    %31 = vector.broadcast %30 : vector<4x8x1xf32> to vector<4x8x8xf32>
    %32 = arith.subf %28, %31 : vector<4x8x8xf32>
    %33 = math.exp %32 : vector<4x8x8xf32>
    %cst_21 = arith.constant dense<0.000000e+00> : vector<4x8xf32>
    %34 = vector.multi_reduction <add>, %33, %cst_21 [2] : vector<4x8x8xf32> to vector<4x8xf32>
    %35 = vector.shape_cast %34 : vector<4x8xf32> to vector<4x8x1xf32>
    %36 = tpu.reciprocal %35 {approx = true} : vector<4x8x1xf32> -> vector<4x8x1xf32>
    %37 = vector.broadcast %36 : vector<4x8x1xf32> to vector<4x8x8xf32>
    %38 = arith.mulf %33, %37 : vector<4x8x8xf32>
    %39 = arith.truncf %38 : vector<4x8x8xf32> to vector<4x8x8xbf16>
    "tpu.trace_start"() <{level = 10 : i32, message = "hqk,hkd->hqd"}> : () -> ()
    %cst_22 = arith.constant dense<0.000000e+00> : vector<4x8x8xf32>
    %40 = tpu.matmul %39, %5, %cst_22 {dimension_numbers = #tpu.dot_dimension_numbers<[2], [1], [1], [2], [0, 0, 0, 1, 1, 2], [0], [0]>} : vector<4x8x8xbf16>, vector<4x8x8xbf16>, vector<4x8x8xf32> -> vector<4x8x8xf32>
    "tpu.trace_stop"() : () -> ()
    %41 = vector.shape_cast %40 : vector<4x8x8xf32> to vector<1x4x8x8xf32>
    %42 = arith.truncf %41 : vector<1x4x8x8xf32> to vector<1x4x8x8xbf16>
    %c0_23 = arith.constant 0 : index
    %c0_24 = arith.constant 0 : index
    %c0_25 = arith.constant 0 : index
    %c0_26 = arith.constant 0 : index
    %43 = vector.load %arg6[%c0_23, %c0_24, %c0_25, %c0_26] : memref<1x4x8x8xbf16, #tpu.memory_space<vmem>>, vector<1x4x8x8xbf16>
    tpu.vector_store %arg6[%c0_23, %c0_24, %c0_25, %c0_26], %42 {strides = array<i32>} : memref<1x4x8x8xbf16, #tpu.memory_space<vmem>>, vector<1x4x8x8xbf16>,
    return
  }
  func.func @transform_0(%arg0: i32) -> (i32, i32, i32, i32) {
    %c0_i32 = arith.constant 0 : i32
    %c0_i32_0 = arith.constant 0 : i32
    %c0_i32_1 = arith.constant 0 : i32
    %c0_i32_2 = arith.constant 0 : i32
    return %arg0, %c0_i32, %c0_i32_0, %c0_i32_1 : i32, i32, i32, i32
  }
  func.func @transform_1(%arg0: i32) -> (i32, i32, i32, i32) {
    %c0_i32 = arith.constant 0 : i32
    %c0_i32_0 = arith.constant 0 : i32
    %c0_i32_1 = arith.constant 0 : i32
    %c0_i32_2 = arith.constant 0 : i32
    return %arg0, %c0_i32, %c0_i32_0, %c0_i32_1 : i32, i32, i32, i32
  }
  func.func @transform_2(%arg0: i32) -> (i32, i32, i32, i32) {
    %c0_i32 = arith.constant 0 : i32
    %c0_i32_0 = arith.constant 0 : i32
    %c0_i32_1 = arith.constant 0 : i32
    %c0_i32_2 = arith.constant 0 : i32
    return %arg0, %c0_i32, %c0_i32_0, %c0_i32_1 : i32, i32, i32, i32
  }
  func.func @transform_3(%arg0: i32) -> (i32, i32, i32) {
    %c0_i32 = arith.constant 0 : i32
    %c0_i32_0 = arith.constant 0 : i32
    %c0_i32_1 = arith.constant 0 : i32
    return %arg0, %c0_i32, %c0_i32_0 : i32, i32, i32
  }
  func.func @transform_4(%arg0: i32) -> (i32, i32, i32) {
    %c0_i32 = arith.constant 0 : i32
    %c0_i32_0 = arith.constant 0 : i32
    %c0_i32_1 = arith.constant 0 : i32
    return %arg0, %c0_i32, %c0_i32_0 : i32, i32, i32
  }
  func.func @transform_5(%arg0: i32) -> (i32, i32, i32, i32) {
    %c0_i32 = arith.constant 0 : i32
    %c0_i32_0 = arith.constant 0 : i32
    %c0_i32_1 = arith.constant 0 : i32
    %c0_i32_2 = arith.constant 0 : i32
    return %arg0, %c0_i32, %c0_i32_0, %c0_i32_1 : i32, i32, i32, i32
  }
}

module attributes {stable_mosaic.version = 11 : i64} {
  func.func @_linear_add_ln_kernel(%arg0: i32, %arg1: memref<16x32xbf16, #tpu.memory_space<vmem>>, %arg2: memref<32x32xbf16, #tpu.memory_space<vmem>>, %arg3: memref<1x32xf32, #tpu.memory_space<vmem>>, %arg4: memref<16x32xf32, #tpu.memory_space<vmem>>, %arg5: memref<1x32xf32, #tpu.memory_space<vmem>>, %arg6: memref<1x32xf32, #tpu.memory_space<vmem>>, %arg7: memref<16x32xf32, #tpu.memory_space<vmem>>) attributes {dimension_semantics = [#tpu.dimension_semantics<parallel>], iteration_bounds = array<i64: 1>, scalar_prefetch = 0 : i64, scratch_operands = 0 : i64, tpu.core_type = #tpu.core_type<tc>, window_params = [{transform_indices = @transform_0, window_bounds = array<i64: 16, 32>}, {pipeline_mode = #tpu.pipeline_mode<synchronous>, transform_indices = @transform_1, window_bounds = array<i64: 32, 32>}, {pipeline_mode = #tpu.pipeline_mode<synchronous>, transform_indices = @transform_2, window_bounds = array<i64: 1, 32>}, {transform_indices = @transform_3, window_bounds = array<i64: 16, 32>}, {pipeline_mode = #tpu.pipeline_mode<synchronous>, transform_indices = @transform_4, window_bounds = array<i64: 1, 32>}, {pipeline_mode = #tpu.pipeline_mode<synchronous>, transform_indices = @transform_5, window_bounds = array<i64: 1, 32>}, {transform_indices = @transform_6, window_bounds = array<i64: 16, 32>}]} {
    %c0 = arith.constant 0 : index
    %c0_0 = arith.constant 0 : index
    %0 = vector.load %arg1[%c0, %c0_0] : memref<16x32xbf16, #tpu.memory_space<vmem>>, vector<16x32xbf16>
    %c0_1 = arith.constant 0 : index
    %c0_2 = arith.constant 0 : index
    %1 = vector.load %arg2[%c0_1, %c0_2] : memref<32x32xbf16, #tpu.memory_space<vmem>>, vector<32x32xbf16>
    %cst = arith.constant dense<0.000000e+00> : vector<16x32xf32>
    %2 = tpu.matmul %0, %1, %cst {dimension_numbers = #tpu.dot_dimension_numbers<[1], [0], [0], [1], [0, 0, 1, 1], [], []>} : vector<16x32xbf16>, vector<32x32xbf16>, vector<16x32xf32> -> vector<16x32xf32>
    %c0_3 = arith.constant 0 : index
    %c0_4 = arith.constant 0 : index
    %3 = vector.load %arg3[%c0_3, %c0_4] : memref<1x32xf32, #tpu.memory_space<vmem>>, vector<1x32xf32>
    %4 = vector.broadcast %3 : vector<1x32xf32> to vector<16x32xf32>
    %5 = arith.addf %2, %4 : vector<16x32xf32>
    %c0_5 = arith.constant 0 : index
    %c0_6 = arith.constant 0 : index
    %6 = vector.load %arg4[%c0_5, %c0_6] : memref<16x32xf32, #tpu.memory_space<vmem>>, vector<16x32xf32>
    %7 = arith.addf %5, %6 : vector<16x32xf32>
    %cst_7 = arith.constant dense<0.000000e+00> : vector<16xf32>
    %8 = vector.multi_reduction <add>, %7, %cst_7 [1] : vector<16x32xf32> to vector<16xf32>
    %9 = vector.shape_cast %8 : vector<16xf32> to vector<16x1xf32>
    %cst_8 = arith.constant 3.200000e+01 : f32
    %10 = vector.broadcast %cst_8 : f32 to vector<16x1xf32>
    %11 = arith.divf %9, %10 : vector<16x1xf32>
    %12 = vector.broadcast %11 : vector<16x1xf32> to vector<16x32xf32>
    %13 = arith.subf %7, %12 : vector<16x32xf32>
    %14 = arith.mulf %13, %13 : vector<16x32xf32>
    %cst_9 = arith.constant dense<0.000000e+00> : vector<16xf32>
    %15 = vector.multi_reduction <add>, %14, %cst_9 [1] : vector<16x32xf32> to vector<16xf32>
    %16 = vector.shape_cast %15 : vector<16xf32> to vector<16x1xf32>
    %cst_10 = arith.constant 3.200000e+01 : f32
    %17 = vector.broadcast %cst_10 : f32 to vector<16x1xf32>
    %18 = arith.divf %16, %17 : vector<16x1xf32>
    %19 = vector.broadcast %11 : vector<16x1xf32> to vector<16x32xf32>
    %20 = arith.subf %7, %19 : vector<16x32xf32>
    %cst_11 = arith.constant 9.99999996E-13 : f32
    %21 = vector.broadcast %cst_11 : f32 to vector<16x1xf32>
    %22 = arith.addf %18, %21 : vector<16x1xf32>
    %23 = math.rsqrt %22 : vector<16x1xf32>
    %24 = vector.broadcast %23 : vector<16x1xf32> to vector<16x32xf32>
    %25 = arith.mulf %20, %24 : vector<16x32xf32>
    %c0_12 = arith.constant 0 : index
    %c0_13 = arith.constant 0 : index
    %26 = vector.load %arg5[%c0_12, %c0_13] : memref<1x32xf32, #tpu.memory_space<vmem>>, vector<1x32xf32>
    %27 = vector.broadcast %26 : vector<1x32xf32> to vector<16x32xf32>
    %28 = arith.mulf %25, %27 : vector<16x32xf32>
    %c0_14 = arith.constant 0 : index
    %c0_15 = arith.constant 0 : index
    %29 = vector.load %arg6[%c0_14, %c0_15] : memref<1x32xf32, #tpu.memory_space<vmem>>, vector<1x32xf32>
    %30 = vector.broadcast %29 : vector<1x32xf32> to vector<16x32xf32>
    %31 = arith.addf %28, %30 : vector<16x32xf32>
    %c0_16 = arith.constant 0 : index
    %c0_17 = arith.constant 0 : index
    %32 = vector.load %arg7[%c0_16, %c0_17] : memref<16x32xf32, #tpu.memory_space<vmem>>, vector<16x32xf32>
    tpu.vector_store %arg7[%c0_16, %c0_17], %31 {strides = array<i32>} : memref<16x32xf32, #tpu.memory_space<vmem>>, vector<16x32xf32>,
    return
  }
  func.func @transform_0(%arg0: i32) -> (i32, i32) {
    %c0_i32 = arith.constant 0 : i32
    %c0_i32_0 = arith.constant 0 : i32
    return %arg0, %c0_i32 : i32, i32
  }
  func.func @transform_1(%arg0: i32) -> (i32, i32) {
    %c0_i32 = arith.constant 0 : i32
    %c0_i32_0 = arith.constant 0 : i32
    %c0_i32_1 = arith.constant 0 : i32
    return %c0_i32, %c0_i32_0 : i32, i32
  }
  func.func @transform_2(%arg0: i32) -> (i32, i32) {
    %c0_i32 = arith.constant 0 : i32
    %c0_i32_0 = arith.constant 0 : i32
    %c0_i32_1 = arith.constant 0 : i32
    return %c0_i32, %c0_i32_0 : i32, i32
  }
  func.func @transform_3(%arg0: i32) -> (i32, i32) {
    %c0_i32 = arith.constant 0 : i32
    %c0_i32_0 = arith.constant 0 : i32
    return %arg0, %c0_i32 : i32, i32
  }
  func.func @transform_4(%arg0: i32) -> (i32, i32) {
    %c0_i32 = arith.constant 0 : i32
    %c0_i32_0 = arith.constant 0 : i32
    %c0_i32_1 = arith.constant 0 : i32
    return %c0_i32, %c0_i32_0 : i32, i32
  }
  func.func @transform_5(%arg0: i32) -> (i32, i32) {
    %c0_i32 = arith.constant 0 : i32
    %c0_i32_0 = arith.constant 0 : i32
    %c0_i32_1 = arith.constant 0 : i32
    return %c0_i32, %c0_i32_0 : i32, i32
  }
  func.func @transform_6(%arg0: i32) -> (i32, i32) {
    %c0_i32 = arith.constant 0 : i32
    %c0_i32_0 = arith.constant 0 : i32
    return %arg0, %c0_i32 : i32, i32
  }
}

module attributes {stable_mosaic.version = 11 : i64} {
  func.func @_ffn_add_ln_kernel(%arg0: i32, %arg1: memref<16x32xf32, #tpu.memory_space<vmem>>, %arg2: memref<32x64xbf16, #tpu.memory_space<vmem>>, %arg3: memref<1x64xf32, #tpu.memory_space<vmem>>, %arg4: memref<64x32xbf16, #tpu.memory_space<vmem>>, %arg5: memref<1x32xf32, #tpu.memory_space<vmem>>, %arg6: memref<1x32xf32, #tpu.memory_space<vmem>>, %arg7: memref<1x32xf32, #tpu.memory_space<vmem>>, %arg8: memref<16x32xf32, #tpu.memory_space<vmem>>) attributes {dimension_semantics = [#tpu.dimension_semantics<parallel>], iteration_bounds = array<i64: 1>, scalar_prefetch = 0 : i64, scratch_operands = 0 : i64, tpu.core_type = #tpu.core_type<tc>, window_params = [{transform_indices = @transform_0, window_bounds = array<i64: 16, 32>}, {pipeline_mode = #tpu.pipeline_mode<synchronous>, transform_indices = @transform_1, window_bounds = array<i64: 32, 64>}, {pipeline_mode = #tpu.pipeline_mode<synchronous>, transform_indices = @transform_2, window_bounds = array<i64: 1, 64>}, {pipeline_mode = #tpu.pipeline_mode<synchronous>, transform_indices = @transform_3, window_bounds = array<i64: 64, 32>}, {pipeline_mode = #tpu.pipeline_mode<synchronous>, transform_indices = @transform_4, window_bounds = array<i64: 1, 32>}, {pipeline_mode = #tpu.pipeline_mode<synchronous>, transform_indices = @transform_5, window_bounds = array<i64: 1, 32>}, {pipeline_mode = #tpu.pipeline_mode<synchronous>, transform_indices = @transform_6, window_bounds = array<i64: 1, 32>}, {transform_indices = @transform_7, window_bounds = array<i64: 16, 32>}]} {
    %c0 = arith.constant 0 : index
    %c0_0 = arith.constant 0 : index
    %0 = vector.load %arg1[%c0, %c0_0] : memref<16x32xf32, #tpu.memory_space<vmem>>, vector<16x32xf32>
    %1 = arith.truncf %0 : vector<16x32xf32> to vector<16x32xbf16>
    %c0_1 = arith.constant 0 : index
    %c0_2 = arith.constant 0 : index
    %2 = vector.load %arg2[%c0_1, %c0_2] : memref<32x64xbf16, #tpu.memory_space<vmem>>, vector<32x64xbf16>
    %cst = arith.constant dense<0.000000e+00> : vector<16x64xf32>
    %3 = tpu.matmul %1, %2, %cst {dimension_numbers = #tpu.dot_dimension_numbers<[1], [0], [0], [1], [0, 0, 1, 1], [], []>} : vector<16x32xbf16>, vector<32x64xbf16>, vector<16x64xf32> -> vector<16x64xf32>
    %c0_3 = arith.constant 0 : index
    %c0_4 = arith.constant 0 : index
    %4 = vector.load %arg3[%c0_3, %c0_4] : memref<1x64xf32, #tpu.memory_space<vmem>>, vector<1x64xf32>
    %5 = vector.broadcast %4 : vector<1x64xf32> to vector<16x64xf32>
    %6 = arith.addf %3, %5 : vector<16x64xf32>
    %cst_5 = arith.constant 0.000000e+00 : f32
    %7 = vector.broadcast %cst_5 : f32 to vector<16x64xf32>
    %8 = arith.maximumf %6, %7 : vector<16x64xf32>
    %9 = arith.truncf %8 : vector<16x64xf32> to vector<16x64xbf16>
    %c0_6 = arith.constant 0 : index
    %c0_7 = arith.constant 0 : index
    %10 = vector.load %arg4[%c0_6, %c0_7] : memref<64x32xbf16, #tpu.memory_space<vmem>>, vector<64x32xbf16>
    %cst_8 = arith.constant dense<0.000000e+00> : vector<16x32xf32>
    %11 = tpu.matmul %9, %10, %cst_8 {dimension_numbers = #tpu.dot_dimension_numbers<[1], [0], [0], [1], [0, 0, 1, 1], [], []>} : vector<16x64xbf16>, vector<64x32xbf16>, vector<16x32xf32> -> vector<16x32xf32>
    %c0_9 = arith.constant 0 : index
    %c0_10 = arith.constant 0 : index
    %12 = vector.load %arg5[%c0_9, %c0_10] : memref<1x32xf32, #tpu.memory_space<vmem>>, vector<1x32xf32>
    %13 = vector.broadcast %12 : vector<1x32xf32> to vector<16x32xf32>
    %14 = arith.addf %11, %13 : vector<16x32xf32>
    %15 = arith.addf %14, %0 : vector<16x32xf32>
    %cst_11 = arith.constant dense<0.000000e+00> : vector<16xf32>
    %16 = vector.multi_reduction <add>, %15, %cst_11 [1] : vector<16x32xf32> to vector<16xf32>
    %17 = vector.shape_cast %16 : vector<16xf32> to vector<16x1xf32>
    %cst_12 = arith.constant 3.200000e+01 : f32
    %18 = vector.broadcast %cst_12 : f32 to vector<16x1xf32>
    %19 = arith.divf %17, %18 : vector<16x1xf32>
    %20 = vector.broadcast %19 : vector<16x1xf32> to vector<16x32xf32>
    %21 = arith.subf %15, %20 : vector<16x32xf32>
    %22 = arith.mulf %21, %21 : vector<16x32xf32>
    %cst_13 = arith.constant dense<0.000000e+00> : vector<16xf32>
    %23 = vector.multi_reduction <add>, %22, %cst_13 [1] : vector<16x32xf32> to vector<16xf32>
    %24 = vector.shape_cast %23 : vector<16xf32> to vector<16x1xf32>
    %cst_14 = arith.constant 3.200000e+01 : f32
    %25 = vector.broadcast %cst_14 : f32 to vector<16x1xf32>
    %26 = arith.divf %24, %25 : vector<16x1xf32>
    %27 = vector.broadcast %19 : vector<16x1xf32> to vector<16x32xf32>
    %28 = arith.subf %15, %27 : vector<16x32xf32>
    %cst_15 = arith.constant 9.99999996E-13 : f32
    %29 = vector.broadcast %cst_15 : f32 to vector<16x1xf32>
    %30 = arith.addf %26, %29 : vector<16x1xf32>
    %31 = math.rsqrt %30 : vector<16x1xf32>
    %32 = vector.broadcast %31 : vector<16x1xf32> to vector<16x32xf32>
    %33 = arith.mulf %28, %32 : vector<16x32xf32>
    %c0_16 = arith.constant 0 : index
    %c0_17 = arith.constant 0 : index
    %34 = vector.load %arg6[%c0_16, %c0_17] : memref<1x32xf32, #tpu.memory_space<vmem>>, vector<1x32xf32>
    %35 = vector.broadcast %34 : vector<1x32xf32> to vector<16x32xf32>
    %36 = arith.mulf %33, %35 : vector<16x32xf32>
    %c0_18 = arith.constant 0 : index
    %c0_19 = arith.constant 0 : index
    %37 = vector.load %arg7[%c0_18, %c0_19] : memref<1x32xf32, #tpu.memory_space<vmem>>, vector<1x32xf32>
    %38 = vector.broadcast %37 : vector<1x32xf32> to vector<16x32xf32>
    %39 = arith.addf %36, %38 : vector<16x32xf32>
    %c0_20 = arith.constant 0 : index
    %c0_21 = arith.constant 0 : index
    %40 = vector.load %arg8[%c0_20, %c0_21] : memref<16x32xf32, #tpu.memory_space<vmem>>, vector<16x32xf32>
    tpu.vector_store %arg8[%c0_20, %c0_21], %39 {strides = array<i32>} : memref<16x32xf32, #tpu.memory_space<vmem>>, vector<16x32xf32>,
    return
  }
  func.func @transform_0(%arg0: i32) -> (i32, i32) {
    %c0_i32 = arith.constant 0 : i32
    %c0_i32_0 = arith.constant 0 : i32
    return %arg0, %c0_i32 : i32, i32
  }
  func.func @transform_1(%arg0: i32) -> (i32, i32) {
    %c0_i32 = arith.constant 0 : i32
    %c0_i32_0 = arith.constant 0 : i32
    %c0_i32_1 = arith.constant 0 : i32
    return %c0_i32, %c0_i32_0 : i32, i32
  }
  func.func @transform_2(%arg0: i32) -> (i32, i32) {
    %c0_i32 = arith.constant 0 : i32
    %c0_i32_0 = arith.constant 0 : i32
    %c0_i32_1 = arith.constant 0 : i32
    return %c0_i32, %c0_i32_0 : i32, i32
  }
  func.func @transform_3(%arg0: i32) -> (i32, i32) {
    %c0_i32 = arith.constant 0 : i32
    %c0_i32_0 = arith.constant 0 : i32
    %c0_i32_1 = arith.constant 0 : i32
    return %c0_i32, %c0_i32_0 : i32, i32
  }
  func.func @transform_4(%arg0: i32) -> (i32, i32) {
    %c0_i32 = arith.constant 0 : i32
    %c0_i32_0 = arith.constant 0 : i32
    %c0_i32_1 = arith.constant 0 : i32
    return %c0_i32, %c0_i32_0 : i32, i32
  }
  func.func @transform_5(%arg0: i32) -> (i32, i32) {
    %c0_i32 = arith.constant 0 : i32
    %c0_i32_0 = arith.constant 0 : i32
    %c0_i32_1 = arith.constant 0 : i32
    return %c0_i32, %c0_i32_0 : i32, i32
  }
  func.func @transform_6(%arg0: i32) -> (i32, i32) {
    %c0_i32 = arith.constant 0 : i32
    %c0_i32_0 = arith.constant 0 : i32
    %c0_i32_1 = arith.constant 0 : i32
    return %c0_i32, %c0_i32_0 : i32, i32
  }
  func.func @transform_7(%arg0: i32) -> (i32, i32) {
    %c0_i32 = arith.constant 0 : i32
    %c0_i32_0 = arith.constant 0 : i32
    return %arg0, %c0_i32 : i32, i32
  }
}

module attributes {stable_mosaic.version = 11 : i64} {
  func.func @_attention_kernel(%arg0: i32, %arg1: memref<1x4x8x8xbf16, #tpu.memory_space<vmem>>, %arg2: memref<1x4x8x8xbf16, #tpu.memory_space<vmem>>, %arg3: memref<1x4x8x8xbf16, #tpu.memory_space<vmem>>, %arg4: memref<1x8x1xf32, #tpu.memory_space<vmem>>, %arg5: memref<1x1x8xf32, #tpu.memory_space<vmem>>, %arg6: memref<1x4x8x8xbf16, #tpu.memory_space<vmem>>) attributes {dimension_semantics = [#tpu.dimension_semantics<parallel>], iteration_bounds = array<i64: 2>, scalar_prefetch = 0 : i64, scratch_operands = 0 : i64, tpu.core_type = #tpu.core_type<tc>, window_params = [{transform_indices = @transform_0, window_bounds = array<i64: 1, 4, 8, 8>}, {transform_indices = @transform_1, window_bounds = array<i64: 1, 4, 8, 8>}, {transform_indices = @transform_2, window_bounds = array<i64: 1, 4, 8, 8>}, {transform_indices = @transform_3, window_bounds = array<i64: 1, 8, 1>}, {transform_indices = @transform_4, window_bounds = array<i64: 1, 1, 8>}, {transform_indices = @transform_5, window_bounds = array<i64: 1, 4, 8, 8>}]} {
    %c0 = arith.constant 0 : index
    %c0_0 = arith.constant 0 : index
    %c0_1 = arith.constant 0 : index
    %c0_2 = arith.constant 0 : index
    %0 = vector.load %arg1[%c0, %c0_0, %c0_1, %c0_2] : memref<1x4x8x8xbf16, #tpu.memory_space<vmem>>, vector<1x4x8x8xbf16>
    %1 = vector.shape_cast %0 : vector<1x4x8x8xbf16> to vector<4x8x8xbf16>
    %c0_3 = arith.constant 0 : index
    %c0_4 = arith.constant 0 : index
    %c0_5 = arith.constant 0 : index
    %c0_6 = arith.constant 0 : index
    %2 = vector.load %arg2[%c0_3, %c0_4, %c0_5, %c0_6] : memref<1x4x8x8xbf16, #tpu.memory_space<vmem>>, vector<1x4x8x8xbf16>
    %3 = vector.shape_cast %2 : vector<1x4x8x8xbf16> to vector<4x8x8xbf16>
    %c0_7 = arith.constant 0 : index
    %c0_8 = arith.constant 0 : index
    %c0_9 = arith.constant 0 : index
    %c0_10 = arith.constant 0 : index
    %4 = vector.load %arg3[%c0_7, %c0_8, %c0_9, %c0_10] : memref<1x4x8x8xbf16, #tpu.memory_space<vmem>>, vector<1x4x8x8xbf16>
    %5 = vector.shape_cast %4 : vector<1x4x8x8xbf16> to vector<4x8x8xbf16>
    "tpu.trace_start"() <{level = 10 : i32, message = "hqd,hkd->hqk"}> : () -> ()
    %cst = arith.constant dense<0.000000e+00> : vector<4x8x8xf32>
    %6 = tpu.matmul %1, %3, %cst {dimension_numbers = #tpu.dot_dimension_numbers<[2], [2], [1], [1], [0, 0, 0, 1, 1, 1], [0], [0]>} : vector<4x8x8xbf16>, vector<4x8x8xbf16>, vector<4x8x8xf32> -> vector<4x8x8xf32>
    "tpu.trace_stop"() : () -> ()
    %cst_11 = arith.constant 0.353553385 : f32
    %7 = vector.broadcast %cst_11 : f32 to vector<4x8x8xf32>
    %8 = arith.mulf %6, %7 : vector<4x8x8xf32>
    %c0_12 = arith.constant 0 : index
    %c0_13 = arith.constant 0 : index
    %c0_14 = arith.constant 0 : index
    %9 = vector.load %arg4[%c0_12, %c0_13, %c0_14] : memref<1x8x1xf32, #tpu.memory_space<vmem>>, vector<1x8x1xf32>
    %10 = vector.shape_cast %9 : vector<1x8x1xf32> to vector<8x1xf32>
    %c0_15 = arith.constant 0 : index
    %c0_16 = arith.constant 0 : index
    %c0_17 = arith.constant 0 : index
    %11 = vector.load %arg5[%c0_15, %c0_16, %c0_17] : memref<1x1x8xf32, #tpu.memory_space<vmem>>, vector<1x1x8xf32>
    %12 = vector.shape_cast %11 : vector<1x1x8xf32> to vector<1x8xf32>
    %13 = vector.broadcast %10 : vector<8x1xf32> to vector<8x8xf32>
    %14 = vector.broadcast %12 : vector<1x8xf32> to vector<8x8xf32>
    %15 = arith.mulf %13, %14 : vector<8x8xf32>
    %16 = vector.shape_cast %15 : vector<8x8xf32> to vector<1x8x8xf32>
    %cst_18 = arith.constant 0.000000e+00 : f32
    %17 = vector.broadcast %cst_18 : f32 to vector<1x8x8xf32>
    %18 = arith.cmpf ogt, %16, %17 : vector<1x8x8xf32>
    %cst_19 = arith.constant -1.000000e+04 : f32
    %19 = vector.shape_cast %18 : vector<1x8x8xi1> to vector<1x8x8xi1>
    %20 = vector.broadcast %19 : vector<1x8x8xi1> to vector<4x8x8xi1>
    %21 = vector.broadcast %cst_19 : f32 to vector<4x8x8xf32>
    %22 = arith.select %20, %8, %21 : vector<4x8x8xi1>, vector<4x8x8xf32>
    %cst_20 = arith.constant dense<0xFF800000> : vector<4x8xf32>
    %23 = vector.multi_reduction <maximumf>, %22, %cst_20 [2] : vector<4x8x8xf32> to vector<4x8xf32>
    %24 = vector.shape_cast %23 : vector<4x8xf32> to vector<4x8x1xf32>
    %25 = vector.broadcast %24 : vector<4x8x1xf32> to vector<4x8x8xf32>
    %26 = arith.subf %22, %25 : vector<4x8x8xf32>
    %27 = math.exp %26 : vector<4x8x8xf32>
    %cst_21 = arith.constant dense<0.000000e+00> : vector<4x8xf32>
    %28 = vector.multi_reduction <add>, %27, %cst_21 [2] : vector<4x8x8xf32> to vector<4x8xf32>
    %29 = vector.shape_cast %28 : vector<4x8xf32> to vector<4x8x1xf32>
    %30 = tpu.reciprocal %29 {approx = true} : vector<4x8x1xf32> -> vector<4x8x1xf32>
    %31 = vector.broadcast %30 : vector<4x8x1xf32> to vector<4x8x8xf32>
    %32 = arith.mulf %27, %31 : vector<4x8x8xf32>
    %33 = arith.truncf %32 : vector<4x8x8xf32> to vector<4x8x8xbf16>
    "tpu.trace_start"() <{level = 10 : i32, message = "hqk,hkd->hqd"}> : () -> ()
    %cst_22 = arith.constant dense<0.000000e+00> : vector<4x8x8xf32>
    %34 = tpu.matmul %33, %5, %cst_22 {dimension_numbers = #tpu.dot_dimension_numbers<[2], [1], [1], [2], [0, 0, 0, 1, 1, 2], [0], [0]>} : vector<4x8x8xbf16>, vector<4x8x8xbf16>, vector<4x8x8xf32> -> vector<4x8x8xf32>
    "tpu.trace_stop"() : () -> ()
    %35 = vector.shape_cast %34 : vector<4x8x8xf32> to vector<1x4x8x8xf32>
    %36 = arith.truncf %35 : vector<1x4x8x8xf32> to vector<1x4x8x8xbf16>
    %c0_23 = arith.constant 0 : index
    %c0_24 = arith.constant 0 : index
    %c0_25 = arith.constant 0 : index
    %c0_26 = arith.constant 0 : index
    %37 = vector.load %arg6[%c0_23, %c0_24, %c0_25, %c0_26] : memref<1x4x8x8xbf16, #tpu.memory_space<vmem>>, vector<1x4x8x8xbf16>
    tpu.vector_store %arg6[%c0_23, %c0_24, %c0_25, %c0_26], %36 {strides = array<i32>} : memref<1x4x8x8xbf16, #tpu.memory_space<vmem>>, vector<1x4x8x8xbf16>,
    return
  }
  func.func @transform_0(%arg0: i32) -> (i32, i32, i32, i32) {
    %c0_i32 = arith.constant 0 : i32
    %c0_i32_0 = arith.constant 0 : i32
    %c0_i32_1 = arith.constant 0 : i32
    %c0_i32_2 = arith.constant 0 : i32
    return %arg0, %c0_i32, %c0_i32_0, %c0_i32_1 : i32, i32, i32, i32
  }
  func.func @transform_1(%arg0: i32) -> (i32, i32, i32, i32) {
    %c0_i32 = arith.constant 0 : i32
    %c0_i32_0 = arith.constant 0 : i32
    %c0_i32_1 = arith.constant 0 : i32
    %c0_i32_2 = arith.constant 0 : i32
    return %arg0, %c0_i32, %c0_i32_0, %c0_i32_1 : i32, i32, i32, i32
  }
  func.func @transform_2(%arg0: i32) -> (i32, i32, i32, i32) {
    %c0_i32 = arith.constant 0 : i32
    %c0_i32_0 = arith.constant 0 : i32
    %c0_i32_1 = arith.constant 0 : i32
    %c0_i32_2 = arith.constant 0 : i32
    return %arg0, %c0_i32, %c0_i32_0, %c0_i32_1 : i32, i32, i32, i32
  }
  func.func @transform_3(%arg0: i32) -> (i32, i32, i32) {
    %c0_i32 = arith.constant 0 : i32
    %c0_i32_0 = arith.constant 0 : i32
    %c0_i32_1 = arith.constant 0 : i32
    return %arg0, %c0_i32, %c0_i32_0 : i32, i32, i32
  }
  func.func @transform_4(%arg0: i32) -> (i32, i32, i32) {
    %c0_i32 = arith.constant 0 : i32
    %c0_i32_0 = arith.constant 0 : i32
    %c0_i32_1 = arith.constant 0 : i32
    return %arg0, %c0_i32, %c0_i32_0 : i32, i32, i32
  }
  func.func @transform_5(%arg0: i32) -> (i32, i32, i32, i32) {
    %c0_i32 = arith.constant 0 : i32
    %c0_i32_0 = arith.constant 0 : i32
    %c0_i32_1 = arith.constant 0 : i32
    %c0_i32_2 = arith.constant 0 : i32
    return %arg0, %c0_i32, %c0_i32_0, %c0_i32_1 : i32, i32, i32, i32
  }
}

module attributes {stable_mosaic.version = 11 : i64} {
  func.func @_linear_kernel(%arg0: i32, %arg1: i32, %arg2: i32, %arg3: memref<16x32xf32, #tpu.memory_space<vmem>>, %arg4: memref<32x128xbf16, #tpu.memory_space<vmem>>, %arg5: memref<1x128xf32, #tpu.memory_space<vmem>>, %arg6: memref<16x128xf32, #tpu.memory_space<vmem>>, %arg7: memref<16x128xf32, #tpu.memory_space<vmem>>) attributes {dimension_semantics = [#tpu.dimension_semantics<parallel>, #tpu.dimension_semantics<parallel>, #tpu.dimension_semantics<arbitrary>], iteration_bounds = array<i64: 1, 1, 1>, scalar_prefetch = 0 : i64, scratch_operands = 1 : i64, tpu.core_type = #tpu.core_type<tc>, window_params = [{transform_indices = @transform_0, window_bounds = array<i64: 16, 32>}, {transform_indices = @transform_1, window_bounds = array<i64: 32, 128>}, {transform_indices = @transform_2, window_bounds = array<i64: 1, 128>}, {transform_indices = @transform_3, window_bounds = array<i64: 16, 128>}]} {
    %c0_i32 = arith.constant 0 : i32
    %0 = arith.cmpi eq, %arg2, %c0_i32 : i32
    %1 = arith.extui %0 : i1 to i32
    %c0_i32_0 = arith.constant 0 : i32
    %2 = arith.cmpi ne, %1, %c0_i32_0 : i32
    scf.if %2 {
      %cst_10 = arith.constant 0.000000e+00 : f32
      %13 = vector.broadcast %cst_10 : f32 to vector<16x128xf32>
      %c0_11 = arith.constant 0 : index
      %c0_12 = arith.constant 0 : index
      %14 = vector.load %arg7[%c0_11, %c0_12] : memref<16x128xf32, #tpu.memory_space<vmem>>, vector<16x128xf32>
      tpu.vector_store %arg7[%c0_11, %c0_12], %13 {strides = array<i32>} : memref<16x128xf32, #tpu.memory_space<vmem>>, vector<16x128xf32>,
    } else {
    }
    %c0 = arith.constant 0 : index
    %c0_1 = arith.constant 0 : index
    %3 = vector.load %arg7[%c0, %c0_1] : memref<16x128xf32, #tpu.memory_space<vmem>>, vector<16x128xf32>
    %c0_2 = arith.constant 0 : index
    %c0_3 = arith.constant 0 : index
    %4 = vector.load %arg3[%c0_2, %c0_3] : memref<16x32xf32, #tpu.memory_space<vmem>>, vector<16x32xf32>
    %5 = arith.truncf %4 : vector<16x32xf32> to vector<16x32xbf16>
    %c0_4 = arith.constant 0 : index
    %c0_5 = arith.constant 0 : index
    %6 = vector.load %arg4[%c0_4, %c0_5] : memref<32x128xbf16, #tpu.memory_space<vmem>>, vector<32x128xbf16>
    %cst = arith.constant dense<0.000000e+00> : vector<16x128xf32>
    %7 = tpu.matmul %5, %6, %cst {dimension_numbers = #tpu.dot_dimension_numbers<[1], [0], [0], [1], [0, 0, 1, 1], [], []>} : vector<16x32xbf16>, vector<32x128xbf16>, vector<16x128xf32> -> vector<16x128xf32>
    %8 = arith.addf %3, %7 : vector<16x128xf32>
    %c0_6 = arith.constant 0 : index
    %c0_7 = arith.constant 0 : index
    %9 = vector.load %arg7[%c0_6, %c0_7] : memref<16x128xf32, #tpu.memory_space<vmem>>, vector<16x128xf32>
    tpu.vector_store %arg7[%c0_6, %c0_7], %8 {strides = array<i32>} : memref<16x128xf32, #tpu.memory_space<vmem>>, vector<16x128xf32>,
    %c0_i32_8 = arith.constant 0 : i32
    %10 = arith.cmpi eq, %arg2, %c0_i32_8 : i32
    %11 = arith.extui %10 : i1 to i32
    %c0_i32_9 = arith.constant 0 : i32
    %12 = arith.cmpi ne, %11, %c0_i32_9 : i32
    scf.if %12 {
      %c0_10 = arith.constant 0 : index
      %c0_11 = arith.constant 0 : index
      %13 = vector.load %arg7[%c0_10, %c0_11] : memref<16x128xf32, #tpu.memory_space<vmem>>, vector<16x128xf32>
      %c0_12 = arith.constant 0 : index
      %c0_13 = arith.constant 0 : index
      %14 = vector.load %arg5[%c0_12, %c0_13] : memref<1x128xf32, #tpu.memory_space<vmem>>, vector<1x128xf32>
      %15 = vector.broadcast %14 : vector<1x128xf32> to vector<16x128xf32>
      %16 = arith.addf %13, %15 : vector<16x128xf32>
      %c0_14 = arith.constant 0 : index
      %c0_15 = arith.constant 0 : index
      %17 = vector.load %arg6[%c0_14, %c0_15] : memref<16x128xf32, #tpu.memory_space<vmem>>, vector<16x128xf32>
      tpu.vector_store %arg6[%c0_14, %c0_15], %16 {strides = array<i32>} : memref<16x128xf32, #tpu.memory_space<vmem>>, vector<16x128xf32>,
    } else {
    }
    return
  }
  func.func @transform_0(%arg0: i32, %arg1: i32, %arg2: i32) -> (i32, i32) {
    %c0_i32 = arith.constant 0 : i32
    return %arg0, %arg2 : i32, i32
  }
  func.func @transform_1(%arg0: i32, %arg1: i32, %arg2: i32) -> (i32, i32) {
    %c0_i32 = arith.constant 0 : i32
    return %arg2, %arg1 : i32, i32
  }
  func.func @transform_2(%arg0: i32, %arg1: i32, %arg2: i32) -> (i32, i32) {
    %c0_i32 = arith.constant 0 : i32
    %c0_i32_0 = arith.constant 0 : i32
    return %c0_i32, %arg1 : i32, i32
  }
  func.func @transform_3(%arg0: i32, %arg1: i32, %arg2: i32) -> (i32, i32) {
    %c0_i32 = arith.constant 0 : i32
    return %arg0, %arg1 : i32, i32
  }
}

</mosaic_0001>

<bundles_post_ra>
// kernel: decoder_forward.18
= control target key start
LH: loop header
LB: loop body
LE: loop exit
PB: predicated region body
PF: predicated region fallthrough
CT: control target
= control target key end

     0   :  { %vm16_vm0 = vcmask 261120   ;;  %s118_s0 = inlined_call_operand.vmem [shape: f32[16,32], index: 0, kind: input, shape index: {}]   ;;  %s119_s1 = inlined_call_operand.vmem [shape: f32[1,32], index: 1, kind: input, shape index: {}]   ;;  %s120_s2 = inlined_call_operand.vmem [shape: f32[1,32], index: 2, kind: input, shape index: {}]   ;;  %s121_s3 = inlined_call_operand.vmem [shape: f32[16,32], index: 3, kind: output, shape index: {}]  }
   0x1   :  { %v14_v0 = vld [vmem:[%s118_s0] sm:$0xff]  ;;  %v15_v1 = vld [vmem:[%s118_s0 + $0x8] sm:$0xff] }
   0x2   :  { %v17_v2 = vsel %vm16_vm0, %v14_v0, 0.0  ;;  %v20_v3 = vsel %vm16_vm0, %v15_v1, 0.0  ;;  %v68_v21 = vld [vmem:[%s119_s1] ss:$0 sm:$0xff] }
   0x3   :  { %18 = vadd.xlane.f32.xlu0 %v17_v2  ;;  %v69_v23 = vld [vmem:[%s120_s2] ss:$0 sm:$0xff] }
   0x7   :  { %21 = vadd.xlane.f32.xlu0 %v20_v3 }
  0x90   :  { %v19_v4 = vpop.xlane.xlu0 %18 }
  0x91   :  { %v24_v5 = vmul.f32 0.03125, %v19_v4 }
  0x93   :  { %v26_v6 = vsub.f32 %v14_v0, %v24_v5 }
  0x94   :  { %v22_v7 = vpop.xlane.xlu0 %21 }
  0x95   :  { %v25_v8 = vmul.f32 0.03125, %v22_v7  ;;  %v28_v9 = vmul.f32 %v26_v6, %v26_v6 }
  0x97   :  { %v27_v10 = vsub.f32 %v15_v1, %v25_v8  ;;  %v30_v11 = vsel %vm16_vm0, %v28_v9, 0.0 }
  0x98   :  { %31 = vadd.xlane.f32.xlu1 %v30_v11 }
  0x99   :  { %v29_v12 = vmul.f32 %v27_v10, %v27_v10 }
  0x9b   :  { %v33_v13 = vsel %vm16_vm0, %v29_v12, 0.0 }
  0x9c   :  { %34 = vadd.xlane.f32.xlu1 %v33_v13 }
 0x125   :  { %v32_v14 = vpop.xlane.xlu1 %31 }
 0x126   :  { %v36_v15 = vmul.f32 0.03125, %v32_v14 }
 0x128   :  { %v38_v16 = vadd.f32 1e-12, %v36_v15 }
 0x129   :  { %v35_v17 = vpop.xlane.xlu1 %34 }
 0x12a   :  { %70 = vrsqrt.f32 %v38_v16  ;;  %v37_v18 = vmul.f32 0.03125, %v35_v17 }
 0x12c   :  { %v39_v19 = vadd.f32 1e-12, %v37_v18 }
 0x12e   :  { %72 = vrsqrt.f32 %v39_v19 }
 0x134   :  { %v71_v20 = vpop.eup %70 }
 0x135   :  { %v42_v22 = vmul.f32 %v71_v20, %v26_v6 }
 0x137   :  { %v51_v24 = vmul.f32 %v68_v21, %v42_v22 }
 0x138   :  { %v73_v25 = vpop.eup %72 }
 0x139   :  { %v60_v26 = vadd.f32 %v69_v23, %v51_v24  ;;  %v43_v27 = vmul.f32 %v73_v25, %v27_v10 }
 0x13b   :  { %62 = vst.msk [vmem:[%s121_s3] sm:$0xff] %vm16_vm0, %v60_v26  ;;  %v52_v28 = vmul.f32 %v68_v21, %v43_v27 }
 0x13d   :  { %v61_v29 = vadd.f32 %v69_v23, %v52_v28 }
 0x13f   :  { %63 = vst.msk [vmem:[%s121_s3 + $0x8] sm:$0xff] %vm16_vm0, %v61_v29 }

// kernel: decoder_forward.19
= control target key start
LH: loop header
LB: loop body
LE: loop exit
PB: predicated region body
PF: predicated region fallthrough
CT: control target
= control target key end

     0   :  { %v147_v0 = vmov 0.0   ;;  %vm148_vm0 = vmmov 0   ;;  %vm42_vm1 = vcmask 261120   ;;  %s187_s1 = inlined_call_operand.vmem [shape: bf16[32,128], index: 1, kind: input, shape index: {}]   ;;  %s188_s0 = inlined_call_operand.vmem [shape: f32[16,32], index: 0, kind: input, shape index: {}]   ;;  %s189_s2 = inlined_call_operand.vmem [shape: f32[1,128], index: 2, kind: input, shape index: {}]   ;;  %s190_s3 = inlined_call_operand.vmem [shape: bf16[16,128], index: 3, kind: output, shape index: {}]  }
   0x1   :  { %135 = vmatprep.subr.bf16.mxu0 %v147_v0  ;;  %v145_v1 = vld [vmem:[%s187_s1] sm:$0xff]   ;;  %139 = vmatprep.mubr.msk.bf16.mxu0 %vm148_vm0, %v147_v0  ;;  %v146_v2 = vld [vmem:[%s187_s1 + $0x8] sm:$0xff]  }
   0x2   :  { %136 = vmatpush3.bf16.msra.mxu0 %v145_v1  ;;  %v23_v3 = vld [vmem:[%s188_s0] sm:$0xff]  ;;  %v24_v4 = vld [vmem:[%s188_s0 + $0x8] sm:$0xff] }
   0x3   :  { %137 = vmatprep.subr.bf16.mxu0 %v147_v0  ;;  %v25_v5 = vpack.c.bf16 %v24_v4, %v23_v3  ;;  %v122_v7 = vld [vmem:[%s189_s2] ss:$0 sm:$0xff] }
   0x6   :  { %138 = vmatpush3.bf16.msra.mxu0 %v146_v2 }
   0x9   :  { %140 = vmatmul.mubr.msk.bf16.vlgmr.msra.gmra.mrb[0].mxu0 %vm42_vm1, %v25_v5 }
  0xdc   :  { %v80_v6 = vpop.f32.mrb[0].mxu0 }
  0xdd   :  { %v141_v8 = vpop.f32.mrb[1].mxu0  ;;  %v103_v10 = vadd.f32 %v122_v7, %v80_v6 }
  0xde   :  { %v83_v9 = vpop.f32.mrb[2].mxu0 }
  0xdf   :  { %v104_v11 = vadd.f32 %v122_v7, %v83_v9  ;;  %v142_v12 = vpop.f32.mrb[3].mxu0 }
  0xe1   :  { %v130_v13 = vpack.c.bf16 %v104_v11, %v103_v10 }
  0xe3   :  { %131 = vst [vmem:[%s190_s3] sm:$0xff] %v130_v13  }

// kernel: decoder_forward.21
= control target key start
LH: loop header
LB: loop body
LE: loop exit
PB: predicated region body
PF: predicated region fallthrough
CT: control target
= control target key end

     0   :  { %v181_v0 = vmov 0.0   ;;  %vm182_vm0 = vmmov 0   ;;  %vm54_vm1 = vcmask 261120   ;;  %s255_s1 = inlined_call_operand.vmem [shape: bf16[32,32], index: 1, kind: input, shape index: {}]   ;;  %s256_s0 = inlined_call_operand.vmem [shape: bf16[16,32], index: 0, kind: input, shape index: {}]   ;;  %s257_s2 = inlined_call_operand.vmem [shape: f32[1,32], index: 2, kind: input, shape index: {}]   ;;  %s258_s3 = inlined_call_operand.vmem [shape: f32[16,32], index: 3, kind: input, shape index: {}]   ;;  %s259_s4 = inlined_call_operand.vmem [shape: f32[1,32], index: 4, kind: input, shape index: {}]   ;;  %s260_s5 = inlined_call_operand.vmem [shape: f32[1,32], index: 5, kind: input, shape index: {}]   ;;  %s261_s6 = inlined_call_operand.vmem [shape: f32[16,32], index: 6, kind: output, shape index: {}]  }
   0x1   :  { %164 = vmatprep.subr.bf16.mxu0 %v181_v0  ;;  %v174_v1 = vld [vmem:[%s255_s1] sm:$0xff]   ;;  %168 = vmatprep.mubr.msk.bf16.mxu0 %vm182_vm0, %v181_v0  ;;  %v175_v2 = vld [vmem:[%s255_s1 + $0x8] sm:$0xff]  }
   0x2   :  { %165 = vmatpush3.bf16.msra.mxu0 %v174_v1  ;;  %v176_v3 = vld [vmem:[%s256_s0] sm:$0xff]   ;;  %v100_v10 = vld [vmem:[%s258_s3 + $0x8] sm:$0xff] }
   0x3   :  { %166 = vmatprep.subr.bf16.mxu0 %v181_v0  ;;  %v154_v4 = vld [vmem:[%s257_s2] ss:$0 sm:$0xff] }
   0x4   :  { %v99_v6 = vld [vmem:[%s258_s3] sm:$0xff] }
   0x5   :  { %v159_v34 = vld [vmem:[%s259_s4] ss:$0 sm:$0xff] }
   0x6   :  { %167 = vmatpush3.bf16.msra.mxu0 %v175_v2  ;;  %v160_v36 = vld [vmem:[%s260_s5] ss:$0 sm:$0xff] }
   0x9   :  { %169 = vmatmul.mubr.msk.bf16.vlgmr.msra.gmra.mrb[0].mxu0 %vm54_vm1, %v176_v3 }
  0xdc   :  { %v92_v5 = vpop.f32.mrb[0].mxu0 }
  0xdd   :  { %v93_v7 = vadd.f32 %v154_v4, %v92_v5  ;;  %v170_v8 = vpop.f32.mrb[1].mxu0 }
  0xde   :  { %v95_v9 = vpop.f32.mrb[2].mxu0 }
  0xdf   :  { %v96_v11 = vadd.f32 %v154_v4, %v95_v9  ;;  %v171_v12 = vpop.f32.mrb[3].mxu0  ;;  %v101_v13 = vadd.f32 %v99_v6, %v93_v7 }
  0xe1   :  { %v103_v14 = vsel %vm54_vm1, %v101_v13, 0.0  ;;  %v102_v15 = vadd.f32 %v100_v10, %v96_v11 }
  0xe2   :  { %104 = vadd.xlane.f32.xlu0 %v103_v14 }
  0xe3   :  { %v106_v16 = vsel %vm54_vm1, %v102_v15, 0.0 }
  0xe6   :  { %107 = vadd.xlane.f32.xlu0 %v106_v16 }
 0x16f   :  { %v105_v17 = vpop.xlane.xlu0 %104 }
 0x170   :  { %v110_v18 = vmul.f32 0.03125, %v105_v17 }
 0x172   :  { %v112_v19 = vsub.f32 %v101_v13, %v110_v18 }
 0x173   :  { %v108_v20 = vpop.xlane.xlu0 %107 }
 0x174   :  { %v111_v21 = vmul.f32 0.03125, %v108_v20  ;;  %v114_v22 = vmul.f32 %v112_v19, %v112_v19 }
 0x176   :  { %v113_v23 = vsub.f32 %v102_v15, %v111_v21  ;;  %v116_v24 = vsel %vm54_vm1, %v114_v22, 0.0 }
 0x177   :  { %117 = vadd.xlane.f32.xlu1 %v116_v24 }
 0x178   :  { %v115_v25 = vmul.f32 %v113_v23, %v113_v23 }
 0x17a   :  { %v119_v26 = vsel %vm54_vm1, %v115_v25, 0.0 }
 0x17b   :  { %120 = vadd.xlane.f32.xlu1 %v119_v26 }
 0x204   :  { %v118_v27 = vpop.xlane.xlu1 %117 }
 0x205   :  { %v122_v28 = vmul.f32 0.03125, %v118_v27 }
 0x207   :  { %v124_v29 = vadd.f32 1e-12, %v122_v28 }
 0x208   :  { %v121_v30 = vpop.xlane.xlu1 %120 }
 0x209   :  { %177 = vrsqrt.f32 %v124_v29  ;;  %v123_v31 = vmul.f32 0.03125, %v121_v30 }
 0x20b   :  { %v125_v32 = vadd.f32 1e-12, %v123_v31 }
 0x20d   :  { %179 = vrsqrt.f32 %v125_v32 }
 0x213   :  { %v178_v33 = vpop.eup %177 }
 0x214   :  { %v128_v35 = vmul.f32 %v178_v33, %v112_v19 }
 0x216   :  { %v137_v37 = vmul.f32 %v159_v34, %v128_v35 }
 0x217   :  { %v180_v38 = vpop.eup %179 }
 0x218   :  { %v146_v39 = vadd.f32 %v160_v36, %v137_v37  ;;  %v129_v40 = vmul.f32 %v180_v38, %v113_v23 }
 0x21a   :  { %148 = vst.msk [vmem:[%s261_s6] sm:$0xff] %vm54_vm1, %v146_v39  ;;  %v138_v41 = vmul.f32 %v159_v34, %v129_v40 }
 0x21c   :  { %v147_v42 = vadd.f32 %v160_v36, %v138_v41 }
 0x21e   :  { %149 = vst.msk [vmem:[%s261_s6 + $0x8] sm:$0xff] %vm54_vm1, %v147_v42 }

// kernel: decoder_forward.20
= control target key start
LH: loop header
LB: loop body
LE: loop exit
PB: predicated region body
PF: predicated region fallthrough
CT: control target
= control target key end

     0   :  { %s1032_s18 = smov 0   ;;  %s1125_s0 = inlined_call_operand.vmem [shape: bf16[2,4,8,8], index: 0, kind: input, shape index: {}]   ;;  %s1126_s1 = inlined_call_operand.vmem [shape: bf16[2,4,8,8], index: 1, kind: input, shape index: {}]   ;;  %s1127_s2 = inlined_call_operand.vmem [shape: bf16[2,4,8,8], index: 2, kind: input, shape index: {}]   ;;  %s1128_s3 = inlined_call_operand.vmem [shape: f32[2,8,1], index: 3, kind: input, shape index: {}]   ;;  %s1129_s4 = inlined_call_operand.vmem [shape: f32[2,1,8], index: 4, kind: input, shape index: {}]   ;;  %s1130_s5 = inlined_call_operand.vmem [shape: bf16[2,4,8,8], index: 5, kind: output, shape index: {}]  }
   0x1 LB: > { %s869_s19 = sadd.s32 4294967295, %s997_s18   ;;  %p873_p0 = scmp.ge.s32.totalorder %s997_s18, 1  ;;  %s997_s18 = sphi %s1032_s18, %s15_s18  }
   0x2   : > { %p224_p1 = scmp.lt.s32.totalorder %s997_s18, 3 }
   0x4   : > { %p225_p2 = pnand %p873_p0, %p224_p1 }
   0x5   : > { %p269_p3 = scmp.lt.s32.totalorder (!%p225_p2), %s869_s19, 1  ;;  %v999_v0 = vmov (!%p225_p2), 0.0   ;;  %vm1000_vm0 = vmmov (!%p225_p2), 0   ;;  %v1001_v1 = vmov (!%p225_p2), 0   ;;  %vm309_vm1 = vcmask (!%p225_p2), 64512  }
   0x6   : > { %228 = sbr.rel (%p225_p2) target bundleno = 783 (0x30f), region = 40  ;;  %915 = vmatprep.subr.bf16.mxu0 (!%p225_p2), %v999_v0  ;;  %921 = vmatprep.subr.bf16.mxu1 (!%p225_p2), %v999_v0  ;;  %v512_v15 = vlaneseq (!%p225_p2)  ;;  %vm578_vm4 = vcmask (!%p225_p2), 1043456   ;;  %vm764_vm5 = vcmask (!%p225_p2), 60416  }
   0x7   : > { %917 = vmatprep.mubr.msk.bf16.mxu0 (!%p225_p2), %vm1000_vm0, %v999_v0  ;;  %923 = vmatprep.mubr.msk.bf16.mxu1 (!%p225_p2), %vm1000_vm0, %v999_v0 }
   0x8   : > { %974 = vset.pattern.permute.xlu0 (!%p225_p2), %v1001_v1  ;;  %v513_v16 = vshrl.u32 (!%p225_p2), %v512_v15, 7  ;;  %v515_v17 = vand.u32 (!%p225_p2), 127, %v512_v15 }
   0xa   : > { %vm516_vm2 = vcmp.le.s32.totalorder (!%p225_p2), %v515_v17, %v513_v16 }
   0xb   : > { %v888_v21 = vsel (!%p225_p2), %vm516_vm2, 1.0, %v999_v0 }
   0xd   : > { %s1132_s19 = smov (!%p269_p3, %s869_s19), 1 }
   0xe   : > { %s1049_s20 = sshll.u32 %s1132_s19, 4  ;;  %s880_s21 = sshll.u32 %s1132_s19, 3 }
   0xf   : > { %s278_s24 = scalar_lea.vmem %s1126_s1, %s1049_s20  ;;  %s287_s27 = scalar_lea.vmem %s1128_s3, %s880_s21 }
  0x10   : > { %v301_v2 = vld [vmem:[%s278_s24] sm:$0xf]  ;;  %v302_v3 = vld [vmem:[%s278_s24 + $0x4] sm:$0xf]  ;;  %s273_s30 = scalar_lea.vmem %s1125_s0, %s1049_s20  ;;  %v303_v7 = vld [vmem:[%s278_s24 + $0x8] sm:$0xf]  ;;  %s290_s8 = scalar_lea.vmem %s1129_s4, %s1132_s19 }
  0x11   : > { %v314_v4 = vsel %vm309_vm1, %v301_v2, 0  ;;  %v360_v5 = vsel %vm309_vm1, %v302_v3, 0  ;;  %v498_v6 = vld [vmem:[%s287_s27] sm:$0xff]  ;;  %v304_v8 = vld [vmem:[%s278_s24 + $0xc] sm:$0xf]  ;;  %v406_v11 = vsel %vm309_vm1, %v303_v7, 0  ;;  %s283_s11 = scalar_lea.vmem %s1127_s2, %s1049_s20  ;;  %s295_s14 = scalar_lea.vmem %s1130_s5, %s1049_s20 }
  0x12   : > { %916 = vmatpush3.bf16.xpose.msra.mxu0 %v314_v4  ;;  %922 = vmatpush3.bf16.xpose.msra.mxu1 %v360_v5  ;;  %v297_v9 = vld [vmem:[%s273_s30] sm:$0xf]  ;;  %v298_v10 = vld [vmem:[%s273_s30 + $0x4] sm:$0xf]  ;;  %v452_v12 = vsel %vm309_vm1, %v304_v8, 0 }
  0x13   : > { %927 = vmatprep.subr.bf16.mxu0 %v999_v0  ;;  %933 = vmatprep.subr.bf16.mxu1 %v999_v0  ;;  %v299_v13 = vld [vmem:[%s273_s30 + $0x8] sm:$0xf]  ;;  %v300_v14 = vld [vmem:[%s273_s30 + $0xc] sm:$0xf]  ;;  %v887_v18 = vld [vmem:[%s290_s8] ss:$0 sm:$0xff] }
  0x14   : > { %502 = vperm.xlu0 %974, %v498_v6   ;;  %v305_v8 = vld [vmem:[%s283_s11] sm:$0xf] }
  0x19   : > { %918 = vmatmul.mubr.msk.bf16.vlgmr.msra.gmra.mrb[0].mxu0 %vm309_vm1, %v297_v9  ;;  %924 = vmatmul.mubr.msk.bf16.vlgmr.msra.gmra.mrb[0].mxu1 %vm309_vm1, %v298_v10  ;;  %v580_v9 = vsel %vm578_vm4, %v305_v8, 0  ;;  %v306_v10 = vld [vmem:[%s283_s11 + $0x4] sm:$0xf] }
  0x1a   : > { %928 = vmatpush3.bf16.xpose.msra.mxu0 %v406_v11  ;;  %934 = vmatpush3.bf16.xpose.msra.mxu1 %v452_v12  ;;  %v626_v11 = vsel %vm578_vm4, %v306_v10, 0  ;;  %v307_v12 = vld [vmem:[%s283_s11 + $0x8] sm:$0xf] }
  0x1b   : > { %929 = vmatprep.mubr.msk.bf16.mxu0 %vm1000_vm0, %v999_v0  ;;  %935 = vmatprep.mubr.msk.bf16.mxu1 %vm1000_vm0, %v999_v0 }
  0x1c   : > { %939 = vmatprep.subr.bf16.mxu0 %v999_v0  ;;  %945 = vmatprep.subr.bf16.mxu1 %v999_v0 }
  0x21   : > { %930 = vmatmul.mubr.msk.bf16.vlgmr.msra.gmra.mrb[4].mxu0 %vm309_vm1, %v299_v13  ;;  %936 = vmatmul.mubr.msk.bf16.vlgmr.msra.gmra.mrb[4].mxu1 %vm309_vm1, %v300_v14  ;;  %v672_v13 = vsel %vm578_vm4, %v307_v12, 0  ;;  %v308_v14 = vld [vmem:[%s283_s11 + $0xc] sm:$0xf] }
  0x22   : > { %941 = vmatprep.mubr.msk.bf16.mxu0 %vm1000_vm0, %v999_v0  ;;  %947 = vmatprep.mubr.msk.bf16.mxu1 %vm1000_vm0, %v999_v0  ;;  %v718_v15 = vsel %vm578_vm4, %v308_v14, 0 }
  0x23   : > { %940 = vmatpush3.bf16.msra.mxu0 %v580_v9  ;;  %946 = vmatpush3.bf16.msra.mxu1 %v626_v11 }
  0x24   : > { %951 = vmatprep.subr.bf16.mxu0 %v999_v0  ;;  %957 = vmatprep.subr.bf16.mxu1 %v999_v0 }
  0x93   : > { %v503_v19 = vpop.permute.xlu0 %502 }
  0x94   : > { %v511_v20 = vmul.f32 %v887_v18, %v503_v19 }
  0x96   : > { %v519_v22 = vmul.f32 %v888_v21, %v511_v20 }
  0x98   : > { %vm520_vm3 = vcmp.gt.f32.partialorder %v519_v22, 0.0 }
  0xec   : > { %v350_v23 = vpop.f32.mrb[0].mxu0  ;;  %v396_v24 = vpop.f32.mrb[0].mxu1 }
  0xed   : > { %v494_v25 = vmul.f32 0.35355338, %v350_v23  ;;  %v495_v26 = vmul.f32 0.35355338, %v396_v24  ;;  %v919_v27 = vpop.f32.mrb[1].mxu0  ;;  %v925_v28 = vpop.f32.mrb[1].mxu1 }
  0xee   : > { %v353_v29 = vpop.f32.mrb[2].mxu0  ;;  %v399_v30 = vpop.f32.mrb[2].mxu1 }
  0xef   : > { %v920_v31 = vpop.f32.mrb[3].mxu0  ;;  %v524_v32 = vsel %vm520_vm3, %v495_v26, -10000.0  ;;  %v926_v33 = vpop.f32.mrb[3].mxu1  ;;  %v523_v34 = vsel %vm520_vm3, %v494_v25, -10000.0 }
  0xf0   : > { %v530_v35 = vsel %vm309_vm1, %v524_v32, -inf  ;;  %v527_v36 = vsel %vm309_vm1, %v523_v34, -inf }
  0xf1   : > { %531 = vmax.xlane.f32.xlu1 %v530_v35  ;;  %528 = vmax.xlane.f32.xlu0 %v527_v36 }
  0xf4   : > { %v442_v37 = vpop.f32.mrb[4].mxu0  ;;  %v488_v38 = vpop.f32.mrb[4].mxu1 }
  0xf5   : > { %v496_v39 = vmul.f32 0.35355338, %v442_v37  ;;  %v497_v40 = vmul.f32 0.35355338, %v488_v38  ;;  %v931_v41 = vpop.f32.mrb[5].mxu0  ;;  %v937_v42 = vpop.f32.mrb[5].mxu1 }
  0xf6   : > { %v445_v43 = vpop.f32.mrb[6].mxu0  ;;  %v491_v44 = vpop.f32.mrb[6].mxu1 }
  0xf7   : > { %v932_v45 = vpop.f32.mrb[7].mxu0  ;;  %v938_v46 = vpop.f32.mrb[7].mxu1  ;;  %v525_v47 = vsel %vm520_vm3, %v496_v39, -10000.0  ;;  %v526_v48 = vsel %vm520_vm3, %v497_v40, -10000.0 }
  0xf8   : > { %v533_v49 = vsel %vm309_vm1, %v525_v47, -inf  ;;  %v536_v50 = vsel %vm309_vm1, %v526_v48, -inf }
  0xf9   : > { %534 = vmax.xlane.f32.xlu1 %v533_v49 }
  0xfd   : > { %537 = vmax.xlane.f32.xlu1 %v536_v50 }
 0x17e   : > { %v532_v51 = vpop.xlane.xlu1 %531  ;;  %v529_v52 = vpop.xlane.xlu0 %528 }
 0x17f   : > { %v540_v53 = vsub.f32 %v524_v32, %v532_v51  ;;  %v539_v54 = vsub.f32 %v523_v34, %v529_v52 }
 0x181   : > { %v543_v55 = vmul.f32 1.442695, %v539_v54  ;;  %v545_v56 = vmul.f32 1.442695, %v540_v53 }
 0x183   : > { %975 = vpow2.f32 %v543_v55 }
 0x184   : > { %977 = vpow2.f32 %v545_v56 }
 0x186   : > { %v535_v57 = vpop.xlane.xlu1 %534 }
 0x187   : > { %v541_v58 = vsub.f32 %v525_v47, %v535_v57 }
 0x189   : > { %v547_v59 = vmul.f32 1.442695, %v541_v58 }
 0x18a   : > { %v538_v60 = vpop.xlane.xlu1 %537 }
 0x18b   : > { %979 = vpow2.f32 %v547_v59  ;;  %v542_v61 = vsub.f32 %v526_v48, %v538_v60 }
 0x18d   : > { %v549_v62 = vmul.f32 1.442695, %v542_v61  ;;  %v976_v63 = vpop.eup %975 }
 0x18e   : > { %v551_v1 = vsel %vm309_vm1, %v976_v63, 0.0  ;;  %v978_v2 = vpop.eup %977 }
 0x18f   : > { %981 = vpow2.f32 %v549_v62  ;;  %552 = vadd.xlane.f32.xlu1 %v551_v1  ;;  %v554_v3 = vsel %vm309_vm1, %v978_v2, 0.0 }
 0x193   : > { %555 = vadd.xlane.f32.xlu1 %v554_v3 }
 0x195   : > { %v980_v4 = vpop.eup %979 }
 0x196   : > { %v557_v5 = vsel %vm309_vm1, %v980_v4, 0.0 }
 0x197   : > { %558 = vadd.xlane.f32.xlu1 %v557_v5 }
 0x199   : > { %v982_v6 = vpop.eup %981 }
 0x19a   : > { %v560_v7 = vsel %vm309_vm1, %v982_v6, 0.0 }
 0x19b   : > { %561 = vadd.xlane.f32.xlu1 %v560_v7 }
 0x21c   : > { %v553_v16 = vpop.xlane.xlu1 %552 }
 0x21d   : > { %983 = vrcp.f32 %v553_v16 }
 0x220   : > { %v556_v17 = vpop.xlane.xlu1 %555 }
 0x221   : > { %985 = vrcp.f32 %v556_v17 }
 0x224   : > { %v559_v18 = vpop.xlane.xlu1 %558 }
 0x225   : > { %987 = vrcp.f32 %v559_v18 }
 0x227   : > { %v984_v19 = vpop.eup %983 }
 0x228   : > { %v567_v20 = vmul.f32 %v984_v19, %v976_v63  ;;  %v562_v21 = vpop.xlane.xlu1 %561 }
 0x229   : > { %989 = vrcp.f32 %v562_v21 }
 0x22a   : > { %v571_v22 = vpack.c.bf16 %v567_v20, %v567_v20 }
 0x22b   : > { %v986_v23 = vpop.eup %985 }
 0x22c   : > { %v568_v24 = vmul.f32 %v986_v23, %v978_v2  ;;  %942 = vmatmul.mubr.msk.bf16.vlgmr.msra.gmra.mrb[8].mxu0 %vm309_vm1, %v571_v22 }
 0x22d   : > { %952 = vmatpush3.bf16.msra.mxu0 %v672_v13  ;;  %953 = vmatprep.mubr.msk.bf16.mxu0 %vm1000_vm0, %v999_v0 }
 0x22e   : > { %v572_v25 = vpack.c.bf16 %v568_v24, %v568_v24 }
 0x22f   : > { %v988_v26 = vpop.eup %987 }
 0x230   : > { %v569_v27 = vmul.f32 %v988_v26, %v980_v4  ;;  %948 = vmatmul.mubr.msk.bf16.vlgmr.msra.gmra.mrb[8].mxu1 %vm309_vm1, %v572_v25 }
 0x231   : > { %958 = vmatpush3.bf16.msra.mxu1 %v718_v15  ;;  %959 = vmatprep.mubr.msk.bf16.mxu1 %vm1000_vm0, %v999_v0 }
 0x232   : > { %v573_v28 = vpack.c.bf16 %v569_v27, %v569_v27 }
 0x233   : > { %v990_v29 = vpop.eup %989 }
 0x234   : > { %v570_v30 = vmul.f32 %v990_v29, %v982_v6  ;;  %954 = vmatmul.mubr.msk.bf16.vlgmr.msra.gmra.mrb[12].mxu0 %vm309_vm1, %v573_v28 }
 0x236   : > { %v574_v31 = vpack.c.bf16 %v570_v30, %v570_v30 }
 0x238   : > { %960 = vmatmul.mubr.msk.bf16.vlgmr.msra.gmra.mrb[12].mxu1 %vm309_vm1, %v574_v31 }
 0x2ff   : > { %v616_v32 = vpop.f32.mrb[8].mxu0 }
 0x300   : > { %v760_v33 = vpack.c.bf16 %v616_v32, %v616_v32  ;;  %v943_v34 = vpop.f32.mrb[9].mxu0 }
 0x301   : > { %v619_v35 = vpop.f32.mrb[10].mxu0 }
 0x302   : > { %765 = vst.msk [vmem:[%s295_s14] sm:$0xf] %vm764_vm5, %v760_v33  ;;  %v944_v0 = vpop.f32.mrb[11].mxu0 }
 0x303   : > { %v662_v36 = vpop.f32.mrb[8].mxu1 }
 0x304   : > { %v761_v37 = vpack.c.bf16 %v662_v36, %v662_v36  ;;  %v949_v38 = vpop.f32.mrb[9].mxu1 }
 0x305   : > { %v665_v39 = vpop.f32.mrb[10].mxu1 }
 0x306   : > { %766 = vst.msk [vmem:[%s295_s14 + $0x4] sm:$0xf] %vm764_vm5, %v761_v37  ;;  %v950_v40 = vpop.f32.mrb[11].mxu1 }
 0x307   : > { %v708_v41 = vpop.f32.mrb[12].mxu0 }
 0x308   : > { %v762_v42 = vpack.c.bf16 %v708_v41, %v708_v41  ;;  %v955_v43 = vpop.f32.mrb[13].mxu0 }
 0x309   : > { %v711_v44 = vpop.f32.mrb[14].mxu0 }
 0x30a   : > { %767 = vst.msk [vmem:[%s295_s14 + $0x8] sm:$0xf] %vm764_vm5, %v762_v42  ;;  %v956_v45 = vpop.f32.mrb[15].mxu0 }
 0x30b   : > { %v754_v46 = vpop.f32.mrb[12].mxu1 }
 0x30c   : > { %v763_v47 = vpack.c.bf16 %v754_v46, %v754_v46  ;;  %v961_v48 = vpop.f32.mrb[13].mxu1 }
 0x30d   : > { %v757_v49 = vpop.f32.mrb[14].mxu1 }
 0x30e   : > { %768 = vst.msk [vmem:[%s295_s14 + $0xc] sm:$0xf] %vm764_vm5, %v763_v47  ;;  %v962_v50 = vpop.f32.mrb[15].mxu1 }
 0x30f PF: > { %s15_s18 = sadd.s32 1, %s997_s18  }
 0x310   : > { %p12_p4 = scmp.ge.s32.totalorder %s15_s18, 4  }
 0x312   :  { %14 = sbr.rel (!%p12_p4) target bundleno = 1 (0x1), region = 82 }

// kernel: decoder_forward.26
= control target key start
LH: loop header
LB: loop body
LE: loop exit
PB: predicated region body
PF: predicated region fallthrough
CT: control target
= control target key end

     0   :  { %v290_v0 = vmov 0.0   ;;  %vm291_vm0 = vmmov 0   ;;  %vm53_vm1 = vcmask 261120   ;;  %vm140_vm2 = vcmask 523264   ;;  %s381_s1 = inlined_call_operand.vmem [shape: bf16[32,64], index: 1, kind: input, shape index: {}]   ;;  %s382_s0 = inlined_call_operand.vmem [shape: f32[16,32], index: 0, kind: input, shape index: {}]   ;;  %s383_s3 = inlined_call_operand.vmem [shape: bf16[64,32], index: 3, kind: input, shape index: {}]   ;;  %s384_s2 = inlined_call_operand.vmem [shape: f32[1,64], index: 2, kind: input, shape index: {}]   ;;  %s385_s4 = inlined_call_operand.vmem [shape: f32[1,32], index: 4, kind: input, shape index: {}]   ;;  %s386_s5 = inlined_call_operand.vmem [shape: f32[1,32], index: 5, kind: input, shape index: {}]   ;;  %s387_s6 = inlined_call_operand.vmem [shape: f32[1,32], index: 6, kind: input, shape index: {}]   ;;  %s388_s7 = inlined_call_operand.vmem [shape: f32[16,32], index: 7, kind: output, shape index: {}]  }
   0x1   :  { %258 = vmatprep.subr.bf16.mxu0 %v290_v0  ;;  %v280_v1 = vld [vmem:[%s381_s1] sm:$0xff]   ;;  %262 = vmatprep.mubr.msk.bf16.mxu0 %vm291_vm0, %v290_v0  ;;  %v281_v2 = vld [vmem:[%s381_s1 + $0x8] sm:$0xff]   ;;  %v284_v8 = vld [vmem:[%s383_s3 + $0x10] sm:$0xff]  }
   0x2   :  { %266 = vmatprep.subr.bf16.mxu1 %v290_v0  ;;  %274 = vmatprep.mubr.msk.bf16.mxu1 %vm291_vm0, %v290_v0  ;;  %v27_v3 = vld [vmem:[%s382_s0] sm:$0xff]  ;;  %v28_v4 = vld [vmem:[%s382_s0 + $0x8] sm:$0xff]  ;;  %v285_v9 = vld [vmem:[%s383_s3 + $0x18] sm:$0xff]  }
   0x3   :  { %259 = vmatpush3.bf16.msra.mxu0 %v280_v1  ;;  %v282_v5 = vld [vmem:[%s383_s3] sm:$0xff]   ;;  %v283_v6 = vld [vmem:[%s383_s3 + $0x8] sm:$0xff]   ;;  %v29_v7 = vpack.c.bf16 %v28_v4, %v27_v3 }
   0x4   :  { %260 = vmatprep.subr.bf16.mxu0 %v290_v0  ;;  %267 = vmatpush3.bf16.msra.mxu1 %v282_v5  ;;  %v238_v10 = vld [vmem:[%s384_s2] ss:$0 sm:$0xff] }
   0x5   :  { %268 = vmatprep.subr.bf16.mxu1 %v290_v0  ;;  %v242_v20 = vld [vmem:[%s385_s4] ss:$0 sm:$0xff] }
   0x6   :  { %v248_v48 = vld [vmem:[%s386_s5] ss:$0 sm:$0xff] }
   0x7   :  { %261 = vmatpush3.bf16.msra.mxu0 %v281_v2  ;;  %v249_v50 = vld [vmem:[%s387_s6] ss:$0 sm:$0xff] }
   0x8   :  { %269 = vmatpush3.bf16.msra.mxu1 %v283_v6 }
   0x9   :  { %270 = vmatprep.subr.bf16.mxu1 %v290_v0 }
   0xa   :  { %263 = vmatmul.mubr.msk.bf16.vlgmr.msra.gmra.mrb[0].mxu0 %vm53_vm1, %v29_v7 }
   0xc   :  { %271 = vmatpush3.bf16.msra.mxu1 %v284_v8 }
   0xd   :  { %272 = vmatprep.subr.bf16.mxu1 %v290_v0 }
  0x10   :  { %273 = vmatpush3.bf16.msra.mxu1 %v285_v9 }
  0xdd   :  { %v91_v11 = vpop.f32.mrb[0].mxu0 }
  0xde   :  { %v92_v12 = vadd.f32 %v238_v10, %v91_v11  ;;  %v264_v13 = vpop.f32.mrb[1].mxu0 }
  0xdf   :  { %v94_v14 = vpop.f32.mrb[2].mxu0 }
  0xe0   :  { %v95_v15 = vadd.f32 %v238_v10, %v94_v14  ;;  %v265_v16 = vpop.f32.mrb[3].mxu0  ;;  %v98_v17 = vmax.f32 %v92_v12, 0.0 }
  0xe2   :  { %v99_v18 = vmax.f32 %v95_v15, 0.0 }
  0xe4   :  { %v100_v19 = vpack.c.bf16 %v99_v18, %v98_v17 }
  0xe6   :  { %275 = vmatmul.mubr.msk.bf16.vlgmr.msra.gmra.mrb[0].mxu1 %vm140_vm2, %v100_v19 }
 0x1b9   :  { %v178_v21 = vpop.f32.mrb[0].mxu1 }
 0x1ba   :  { %v179_v22 = vadd.f32 %v242_v20, %v178_v21  ;;  %v276_v23 = vpop.f32.mrb[1].mxu1 }
 0x1bb   :  { %v181_v24 = vpop.f32.mrb[2].mxu1 }
 0x1bc   :  { %v182_v25 = vadd.f32 %v242_v20, %v181_v24  ;;  %v277_v26 = vpop.f32.mrb[3].mxu1  ;;  %v185_v27 = vadd.f32 %v179_v22, %v27_v3 }
 0x1be   :  { %v187_v28 = vsel %vm53_vm1, %v185_v27, 0.0  ;;  %v186_v29 = vadd.f32 %v182_v25, %v28_v4 }
 0x1bf   :  { %188 = vadd.xlane.f32.xlu0 %v187_v28 }
 0x1c0   :  { %v190_v30 = vsel %vm53_vm1, %v186_v29, 0.0 }
 0x1c3   :  { %191 = vadd.xlane.f32.xlu0 %v190_v30 }
 0x24c   :  { %v189_v31 = vpop.xlane.xlu0 %188 }
 0x24d   :  { %v194_v32 = vmul.f32 0.03125, %v189_v31 }
 0x24f   :  { %v196_v33 = vsub.f32 %v185_v27, %v194_v32 }
 0x250   :  { %v192_v34 = vpop.xlane.xlu0 %191 }
 0x251   :  { %v195_v35 = vmul.f32 0.03125, %v192_v34  ;;  %v198_v36 = vmul.f32 %v196_v33, %v196_v33 }
 0x253   :  { %v197_v37 = vsub.f32 %v186_v29, %v195_v35  ;;  %v200_v38 = vsel %vm53_vm1, %v198_v36, 0.0 }
 0x254   :  { %201 = vadd.xlane.f32.xlu1 %v200_v38 }
 0x255   :  { %v199_v39 = vmul.f32 %v197_v37, %v197_v37 }
 0x257   :  { %v203_v40 = vsel %vm53_vm1, %v199_v39, 0.0 }
 0x258   :  { %204 = vadd.xlane.f32.xlu1 %v203_v40 }
 0x2e1   :  { %v202_v41 = vpop.xlane.xlu1 %201 }
 0x2e2   :  { %v206_v42 = vmul.f32 0.03125, %v202_v41 }
 0x2e4   :  { %v208_v43 = vadd.f32 1e-12, %v206_v42 }
 0x2e5   :  { %v205_v44 = vpop.xlane.xlu1 %204 }
 0x2e6   :  { %286 = vrsqrt.f32 %v208_v43  ;;  %v207_v45 = vmul.f32 0.03125, %v205_v44 }
 0x2e8   :  { %v209_v46 = vadd.f32 1e-12, %v207_v45 }
 0x2ea   :  { %288 = vrsqrt.f32 %v209_v46 }
 0x2f0   :  { %v287_v47 = vpop.eup %286 }
 0x2f1   :  { %v212_v49 = vmul.f32 %v287_v47, %v196_v33 }
 0x2f3   :  { %v221_v51 = vmul.f32 %v248_v48, %v212_v49 }
 0x2f4   :  { %v289_v52 = vpop.eup %288 }
 0x2f5   :  { %v230_v53 = vadd.f32 %v249_v50, %v221_v51  ;;  %v213_v54 = vmul.f32 %v289_v52, %v197_v37 }
 0x2f7   :  { %232 = vst.msk [vmem:[%s388_s7] sm:$0xff] %vm53_vm1, %v230_v53  ;;  %v222_v55 = vmul.f32 %v248_v48, %v213_v54 }
 0x2f9   :  { %v231_v56 = vadd.f32 %v249_v50, %v222_v55 }
 0x2fb   :  { %233 = vst.msk [vmem:[%s388_s7 + $0x8] sm:$0xff] %vm53_vm1, %v231_v56 }

// kernel: decoder_forward.35
= control target key start
LH: loop header
LB: loop body
LE: loop exit
PB: predicated region body
PF: predicated region fallthrough
CT: control target
= control target key end

     0   :  { %v130_v0 = vmov 0.0   ;;  %vm131_vm0 = vmmov 0   ;;  %vm42_vm1 = vcmask 261120   ;;  %s173_s1 = inlined_call_operand.vmem [shape: bf16[32,128], index: 1, kind: input, shape index: {}]   ;;  %s174_s0 = inlined_call_operand.vmem [shape: f32[16,32], index: 0, kind: input, shape index: {}]   ;;  %s175_s2 = inlined_call_operand.vmem [shape: f32[1,128], index: 2, kind: input, shape index: {}]   ;;  %s176_s3 = inlined_call_operand.vmem [shape: f32[16,128], index: 3, kind: output, shape index: {}]  }
   0x1   :  { %118 = vmatprep.subr.bf16.mxu0 %v130_v0  ;;  %v128_v1 = vld [vmem:[%s173_s1] sm:$0xff]   ;;  %122 = vmatprep.mubr.msk.bf16.mxu0 %vm131_vm0, %v130_v0  ;;  %v129_v2 = vld [vmem:[%s173_s1 + $0x8] sm:$0xff]  }
   0x2   :  { %119 = vmatpush3.bf16.msra.mxu0 %v128_v1  ;;  %v23_v3 = vld [vmem:[%s174_s0] sm:$0xff]  ;;  %v24_v4 = vld [vmem:[%s174_s0 + $0x8] sm:$0xff] }
   0x3   :  { %120 = vmatprep.subr.bf16.mxu0 %v130_v0  ;;  %v25_v5 = vpack.c.bf16 %v24_v4, %v23_v3  ;;  %v114_v6 = vld [vmem:[%s175_s2] ss:$0 sm:$0xff] }
   0x6   :  { %121 = vmatpush3.bf16.msra.mxu0 %v129_v2 }
   0x9   :  { %123 = vmatmul.mubr.msk.bf16.vlgmr.msra.gmra.mrb[0].mxu0 %vm42_vm1, %v25_v5 }
  0xdc   :  { %v80_v7 = vpop.f32.mrb[0].mxu0 }
  0xdd   :  { %v103_v8 = vadd.f32 %v114_v6, %v80_v7  ;;  %v124_v9 = vpop.f32.mrb[1].mxu0 }
  0xde   :  { %v83_v10 = vpop.f32.mrb[2].mxu0 }
  0xdf   :  { %105 = vst [vmem:[%s176_s3] sm:$0xff] %v103_v8  ;;  %v104_v11 = vadd.f32 %v114_v6, %v83_v10  ;;  %v125_v12 = vpop.f32.mrb[3].mxu0 }
  0xe1   :  { %106 = vst [vmem:[%s176_s3 + $0x8] sm:$0xff] %v104_v11 }

// kernel: decoder_forward.24
= control target key start
LH: loop header
LB: loop body
LE: loop exit
PB: predicated region body
PF: predicated region fallthrough
CT: control target
= control target key end

     0   :  { %s1023_s18 = smov 0   ;;  %s1115_s0 = inlined_call_operand.vmem [shape: bf16[2,4,8,8], index: 0, kind: input, shape index: {}]   ;;  %s1116_s1 = inlined_call_operand.vmem [shape: bf16[2,4,8,8], index: 1, kind: input, shape index: {}]   ;;  %s1117_s2 = inlined_call_operand.vmem [shape: bf16[2,4,8,8], index: 2, kind: input, shape index: {}]   ;;  %s1118_s3 = inlined_call_operand.vmem [shape: f32[2,8,1], index: 3, kind: input, shape index: {}]   ;;  %s1119_s4 = inlined_call_operand.vmem [shape: f32[2,1,8], index: 4, kind: input, shape index: {}]   ;;  %s1120_s5 = inlined_call_operand.vmem [shape: bf16[2,4,8,8], index: 5, kind: output, shape index: {}]  }
   0x1 LB: > { %s861_s19 = sadd.s32 4294967295, %s988_s18   ;;  %p865_p0 = scmp.ge.s32.totalorder %s988_s18, 1  ;;  %s988_s18 = sphi %s1023_s18, %s15_s18  }
   0x2   : > { %p224_p1 = scmp.lt.s32.totalorder %s988_s18, 3 }
   0x4   : > { %p225_p2 = pnand %p865_p0, %p224_p1 }
   0x5   : > { %p269_p3 = scmp.lt.s32.totalorder (!%p225_p2), %s861_s19, 1  ;;  %v990_v0 = vmov (!%p225_p2), 0.0   ;;  %vm991_vm0 = vmmov (!%p225_p2), 0   ;;  %v992_v1 = vmov (!%p225_p2), 0   ;;  %vm309_vm1 = vcmask (!%p225_p2), 64512  }
   0x6   : > { %228 = sbr.rel (%p225_p2) target bundleno = 783 (0x30f), region = 40  ;;  %906 = vmatprep.subr.bf16.mxu0 (!%p225_p2), %v990_v0  ;;  %912 = vmatprep.subr.bf16.mxu1 (!%p225_p2), %v990_v0  ;;  %vm570_vm3 = vcmask (!%p225_p2), 1043456   ;;  %vm756_vm4 = vcmask (!%p225_p2), 60416  }
   0x7   : > { %908 = vmatprep.mubr.msk.bf16.mxu0 (!%p225_p2), %vm991_vm0, %v990_v0  ;;  %914 = vmatprep.mubr.msk.bf16.mxu1 (!%p225_p2), %vm991_vm0, %v990_v0 }
   0x8   : > { %965 = vset.pattern.permute.xlu0 (!%p225_p2), %v992_v1 }
   0xd   : > { %s1122_s19 = smov (!%p269_p3, %s861_s19), 1 }
   0xe   : > { %s1040_s20 = sshll.u32 %s1122_s19, 4  ;;  %s872_s21 = sshll.u32 %s1122_s19, 3 }
   0xf   : > { %s278_s24 = scalar_lea.vmem %s1116_s1, %s1040_s20  ;;  %s287_s27 = scalar_lea.vmem %s1118_s3, %s872_s21 }
  0x10   : > { %v301_v2 = vld [vmem:[%s278_s24] sm:$0xf]  ;;  %v302_v3 = vld [vmem:[%s278_s24 + $0x4] sm:$0xf]  ;;  %s273_s30 = scalar_lea.vmem %s1115_s0, %s1040_s20  ;;  %v303_v7 = vld [vmem:[%s278_s24 + $0x8] sm:$0xf]  ;;  %s290_s8 = scalar_lea.vmem %s1119_s4, %s1122_s19 }
  0x11   : > { %v314_v4 = vsel %vm309_vm1, %v301_v2, 0  ;;  %v360_v5 = vsel %vm309_vm1, %v302_v3, 0  ;;  %v498_v6 = vld [vmem:[%s287_s27] sm:$0xff]  ;;  %v304_v8 = vld [vmem:[%s278_s24 + $0xc] sm:$0xf]  ;;  %v406_v11 = vsel %vm309_vm1, %v303_v7, 0  ;;  %s283_s11 = scalar_lea.vmem %s1117_s2, %s1040_s20  ;;  %s295_s14 = scalar_lea.vmem %s1120_s5, %s1040_s20 }
  0x12   : > { %907 = vmatpush3.bf16.xpose.msra.mxu0 %v314_v4  ;;  %913 = vmatpush3.bf16.xpose.msra.mxu1 %v360_v5  ;;  %v297_v9 = vld [vmem:[%s273_s30] sm:$0xf]  ;;  %v298_v10 = vld [vmem:[%s273_s30 + $0x4] sm:$0xf]  ;;  %v452_v12 = vsel %vm309_vm1, %v304_v8, 0 }
  0x13   : > { %918 = vmatprep.subr.bf16.mxu0 %v990_v0  ;;  %924 = vmatprep.subr.bf16.mxu1 %v990_v0  ;;  %v299_v13 = vld [vmem:[%s273_s30 + $0x8] sm:$0xf]  ;;  %v300_v14 = vld [vmem:[%s273_s30 + $0xc] sm:$0xf]  ;;  %v879_v15 = vld [vmem:[%s290_s8] ss:$0 sm:$0xff] }
  0x14   : > { %502 = vperm.xlu0 %965, %v498_v6   ;;  %v305_v3 = vld [vmem:[%s283_s11] sm:$0xf]  ;;  %v306_v5 = vld [vmem:[%s283_s11 + $0x4] sm:$0xf]  ;;  %v307_v7 = vld [vmem:[%s283_s11 + $0x8] sm:$0xf] }
  0x15   : > { %v572_v4 = vsel %vm570_vm3, %v305_v3, 0  ;;  %v618_v6 = vsel %vm570_vm3, %v306_v5, 0  ;;  %v664_v8 = vsel %vm570_vm3, %v307_v7, 0 }
  0x19   : > { %909 = vmatmul.mubr.msk.bf16.vlgmr.msra.gmra.mrb[0].mxu0 %vm309_vm1, %v297_v9  ;;  %915 = vmatmul.mubr.msk.bf16.vlgmr.msra.gmra.mrb[0].mxu1 %vm309_vm1, %v298_v10  ;;  %v308_v9 = vld [vmem:[%s283_s11 + $0xc] sm:$0xf] }
  0x1a   : > { %919 = vmatpush3.bf16.xpose.msra.mxu0 %v406_v11  ;;  %925 = vmatpush3.bf16.xpose.msra.mxu1 %v452_v12  ;;  %v710_v10 = vsel %vm570_vm3, %v308_v9, 0 }
  0x1b   : > { %920 = vmatprep.mubr.msk.bf16.mxu0 %vm991_vm0, %v990_v0  ;;  %926 = vmatprep.mubr.msk.bf16.mxu1 %vm991_vm0, %v990_v0 }
  0x1c   : > { %930 = vmatprep.subr.bf16.mxu0 %v990_v0  ;;  %936 = vmatprep.subr.bf16.mxu1 %v990_v0 }
  0x21   : > { %921 = vmatmul.mubr.msk.bf16.vlgmr.msra.gmra.mrb[4].mxu0 %vm309_vm1, %v299_v13  ;;  %927 = vmatmul.mubr.msk.bf16.vlgmr.msra.gmra.mrb[4].mxu1 %vm309_vm1, %v300_v14 }
  0x22   : > { %932 = vmatprep.mubr.msk.bf16.mxu0 %vm991_vm0, %v990_v0  ;;  %938 = vmatprep.mubr.msk.bf16.mxu1 %vm991_vm0, %v990_v0 }
  0x23   : > { %931 = vmatpush3.bf16.msra.mxu0 %v572_v4  ;;  %937 = vmatpush3.bf16.msra.mxu1 %v618_v6 }
  0x24   : > { %942 = vmatprep.subr.bf16.mxu0 %v990_v0  ;;  %948 = vmatprep.subr.bf16.mxu1 %v990_v0 }
  0x93   : > { %v503_v16 = vpop.permute.xlu0 %502 }
  0x94   : > { %v511_v17 = vmul.f32 %v879_v15, %v503_v16 }
  0x96   : > { %vm512_vm2 = vcmp.gt.f32.partialorder %v511_v17, 0.0 }
  0xec   : > { %v350_v18 = vpop.f32.mrb[0].mxu0  ;;  %v396_v19 = vpop.f32.mrb[0].mxu1 }
  0xed   : > { %v494_v20 = vmul.f32 0.35355338, %v350_v18  ;;  %v495_v21 = vmul.f32 0.35355338, %v396_v19  ;;  %v910_v22 = vpop.f32.mrb[1].mxu0  ;;  %v916_v23 = vpop.f32.mrb[1].mxu1 }
  0xee   : > { %v353_v24 = vpop.f32.mrb[2].mxu0  ;;  %v399_v25 = vpop.f32.mrb[2].mxu1 }
  0xef   : > { %v911_v26 = vpop.f32.mrb[3].mxu0  ;;  %v516_v27 = vsel %vm512_vm2, %v495_v21, -10000.0  ;;  %v917_v28 = vpop.f32.mrb[3].mxu1  ;;  %v515_v29 = vsel %vm512_vm2, %v494_v20, -10000.0 }
  0xf0   : > { %v522_v30 = vsel %vm309_vm1, %v516_v27, -inf  ;;  %v519_v31 = vsel %vm309_vm1, %v515_v29, -inf }
  0xf1   : > { %523 = vmax.xlane.f32.xlu1 %v522_v30  ;;  %520 = vmax.xlane.f32.xlu0 %v519_v31 }
  0xf4   : > { %v442_v32 = vpop.f32.mrb[4].mxu0  ;;  %v488_v33 = vpop.f32.mrb[4].mxu1 }
  0xf5   : > { %v496_v34 = vmul.f32 0.35355338, %v442_v32  ;;  %v497_v35 = vmul.f32 0.35355338, %v488_v33  ;;  %v922_v36 = vpop.f32.mrb[5].mxu0  ;;  %v928_v37 = vpop.f32.mrb[5].mxu1 }
  0xf6   : > { %v445_v38 = vpop.f32.mrb[6].mxu0  ;;  %v491_v39 = vpop.f32.mrb[6].mxu1 }
  0xf7   : > { %v923_v40 = vpop.f32.mrb[7].mxu0  ;;  %v929_v41 = vpop.f32.mrb[7].mxu1  ;;  %v517_v42 = vsel %vm512_vm2, %v496_v34, -10000.0  ;;  %v518_v43 = vsel %vm512_vm2, %v497_v35, -10000.0 }
  0xf8   : > { %v525_v44 = vsel %vm309_vm1, %v517_v42, -inf  ;;  %v528_v45 = vsel %vm309_vm1, %v518_v43, -inf }
  0xf9   : > { %526 = vmax.xlane.f32.xlu1 %v525_v44 }
  0xfd   : > { %529 = vmax.xlane.f32.xlu1 %v528_v45 }
 0x17e   : > { %v524_v46 = vpop.xlane.xlu1 %523  ;;  %v521_v47 = vpop.xlane.xlu0 %520 }
 0x17f   : > { %v532_v48 = vsub.f32 %v516_v27, %v524_v46  ;;  %v531_v49 = vsub.f32 %v515_v29, %v521_v47 }
 0x181   : > { %v535_v50 = vmul.f32 1.442695, %v531_v49  ;;  %v537_v51 = vmul.f32 1.442695, %v532_v48 }
 0x183   : > { %966 = vpow2.f32 %v535_v50 }
 0x184   : > { %968 = vpow2.f32 %v537_v51 }
 0x186   : > { %v527_v52 = vpop.xlane.xlu1 %526 }
 0x187   : > { %v533_v53 = vsub.f32 %v517_v42, %v527_v52 }
 0x189   : > { %v539_v54 = vmul.f32 1.442695, %v533_v53 }
 0x18a   : > { %v530_v55 = vpop.xlane.xlu1 %529 }
 0x18b   : > { %970 = vpow2.f32 %v539_v54  ;;  %v534_v56 = vsub.f32 %v518_v43, %v530_v55 }
 0x18d   : > { %v541_v57 = vmul.f32 1.442695, %v534_v56  ;;  %v967_v58 = vpop.eup %966 }
 0x18e   : > { %v543_v59 = vsel %vm309_vm1, %v967_v58, 0.0  ;;  %v969_v60 = vpop.eup %968 }
 0x18f   : > { %972 = vpow2.f32 %v541_v57  ;;  %544 = vadd.xlane.f32.xlu1 %v543_v59  ;;  %v546_v61 = vsel %vm309_vm1, %v969_v60, 0.0 }
 0x193   : > { %547 = vadd.xlane.f32.xlu1 %v546_v61 }
 0x195   : > { %v971_v62 = vpop.eup %970 }
 0x196   : > { %v549_v63 = vsel %vm309_vm1, %v971_v62, 0.0 }
 0x197   : > { %550 = vadd.xlane.f32.xlu1 %v549_v63 }
 0x199   : > { %v973_v1 = vpop.eup %972 }
 0x19a   : > { %v552_v2 = vsel %vm309_vm1, %v973_v1, 0.0 }
 0x19b   : > { %553 = vadd.xlane.f32.xlu1 %v552_v2 }
 0x21c   : > { %v545_v11 = vpop.xlane.xlu1 %544 }
 0x21d   : > { %974 = vrcp.f32 %v545_v11 }
 0x220   : > { %v548_v12 = vpop.xlane.xlu1 %547 }
 0x221   : > { %976 = vrcp.f32 %v548_v12 }
 0x224   : > { %v551_v13 = vpop.xlane.xlu1 %550 }
 0x225   : > { %978 = vrcp.f32 %v551_v13 }
 0x227   : > { %v975_v14 = vpop.eup %974 }
 0x228   : > { %v559_v15 = vmul.f32 %v975_v14, %v967_v58  ;;  %v554_v16 = vpop.xlane.xlu1 %553 }
 0x229   : > { %980 = vrcp.f32 %v554_v16 }
 0x22a   : > { %v563_v17 = vpack.c.bf16 %v559_v15, %v559_v15 }
 0x22b   : > { %v977_v18 = vpop.eup %976 }
 0x22c   : > { %v560_v19 = vmul.f32 %v977_v18, %v969_v60  ;;  %933 = vmatmul.mubr.msk.bf16.vlgmr.msra.gmra.mrb[8].mxu0 %vm309_vm1, %v563_v17 }
 0x22d   : > { %943 = vmatpush3.bf16.msra.mxu0 %v664_v8  ;;  %944 = vmatprep.mubr.msk.bf16.mxu0 %vm991_vm0, %v990_v0 }
 0x22e   : > { %v564_v20 = vpack.c.bf16 %v560_v19, %v560_v19 }
 0x22f   : > { %v979_v21 = vpop.eup %978 }
 0x230   : > { %v561_v22 = vmul.f32 %v979_v21, %v971_v62  ;;  %939 = vmatmul.mubr.msk.bf16.vlgmr.msra.gmra.mrb[8].mxu1 %vm309_vm1, %v564_v20 }
 0x231   : > { %949 = vmatpush3.bf16.msra.mxu1 %v710_v10  ;;  %950 = vmatprep.mubr.msk.bf16.mxu1 %vm991_vm0, %v990_v0 }
 0x232   : > { %v565_v23 = vpack.c.bf16 %v561_v22, %v561_v22 }
 0x233   : > { %v981_v24 = vpop.eup %980 }
 0x234   : > { %v562_v25 = vmul.f32 %v981_v24, %v973_v1  ;;  %945 = vmatmul.mubr.msk.bf16.vlgmr.msra.gmra.mrb[12].mxu0 %vm309_vm1, %v565_v23 }
 0x236   : > { %v566_v26 = vpack.c.bf16 %v562_v25, %v562_v25 }
 0x238   : > { %951 = vmatmul.mubr.msk.bf16.vlgmr.msra.gmra.mrb[12].mxu1 %vm309_vm1, %v566_v26 }
 0x2ff   : > { %v608_v27 = vpop.f32.mrb[8].mxu0 }
 0x300   : > { %v752_v28 = vpack.c.bf16 %v608_v27, %v608_v27  ;;  %v934_v29 = vpop.f32.mrb[9].mxu0 }
 0x301   : > { %v611_v30 = vpop.f32.mrb[10].mxu0 }
 0x302   : > { %757 = vst.msk [vmem:[%s295_s14] sm:$0xf] %vm756_vm4, %v752_v28  ;;  %v935_v0 = vpop.f32.mrb[11].mxu0 }
 0x303   : > { %v654_v31 = vpop.f32.mrb[8].mxu1 }
 0x304   : > { %v753_v32 = vpack.c.bf16 %v654_v31, %v654_v31  ;;  %v940_v33 = vpop.f32.mrb[9].mxu1 }
 0x305   : > { %v657_v34 = vpop.f32.mrb[10].mxu1 }
 0x306   : > { %758 = vst.msk [vmem:[%s295_s14 + $0x4] sm:$0xf] %vm756_vm4, %v753_v32  ;;  %v941_v35 = vpop.f32.mrb[11].mxu1 }
 0x307   : > { %v700_v36 = vpop.f32.mrb[12].mxu0 }
 0x308   : > { %v754_v37 = vpack.c.bf16 %v700_v36, %v700_v36  ;;  %v946_v38 = vpop.f32.mrb[13].mxu0 }
 0x309   : > { %v703_v39 = vpop.f32.mrb[14].mxu0 }
 0x30a   : > { %759 = vst.msk [vmem:[%s295_s14 + $0x8] sm:$0xf] %vm756_vm4, %v754_v37  ;;  %v947_v40 = vpop.f32.mrb[15].mxu0 }
 0x30b   : > { %v746_v41 = vpop.f32.mrb[12].mxu1 }
 0x30c   : > { %v755_v42 = vpack.c.bf16 %v746_v41, %v746_v41  ;;  %v952_v43 = vpop.f32.mrb[13].mxu1 }
 0x30d   : > { %v749_v44 = vpop.f32.mrb[14].mxu1 }
 0x30e   : > { %760 = vst.msk [vmem:[%s295_s14 + $0xc] sm:$0xf] %vm756_vm4, %v755_v42  ;;  %v953_v45 = vpop.f32.mrb[15].mxu1 }
 0x30f PF: > { %s15_s18 = sadd.s32 1, %s988_s18  }
 0x310   : > { %p12_p4 = scmp.ge.s32.totalorder %s15_s18, 4  }
 0x312   :  { %14 = sbr.rel (!%p12_p4) target bundleno = 1 (0x1), region = 82 }

</bundles_post_ra>
